<compile_context>
chip_gen: v6e
topology: v6e:2x2x1
jax: 0.10.0
libtpu: 0.0.40
codegen_flags: <defaults>
</compile_context>

<pallas_src>
import jax
import jax.numpy as jnp
import numpy as np
from jax.experimental import pallas as pl
from jax.experimental.pallas import tpu as pltpu

LEAKY_SLOPE = 0.2
BN_EPS = 1e-5


def _origin_add_gcn_kernel(
    x_ref,        # (bt, HW, Cf) bf16   backbone features, channels-last
    wcat_ref,     # (D+N, Cf)    bf16   [conv_transform ; fc] fused 1x1 weights
    bct_ref,      # (1, D)       f32    conv_transform bias
    adjs_ref,     # (N, N)       bf16   gcn.static_adj weight (no bias)
    wswT_ref,     # (D, D)       bf16   gcn.static_weight weight, transposed
    bsw_ref,      # (1, D)       f32
    wgT_ref,      # (D, D)       bf16   gcn.conv_global weight, transposed
    bg_ref,       # (1, D)       f32
    bns_ref,      # (1, D)       f32    folded BN scale = gamma * rsqrt(rv + eps)
    bnb_ref,      # (1, D)       f32    folded BN shift = beta - rm * scale
    wcc1T_ref,    # (D, N)       bf16   conv_create_co_mat global half, transposed
    wcc2T_ref,    # (D, N)       bf16   conv_create_co_mat local half, transposed
    bcc_ref,      # (1, N)       f32
    wdwT_ref,     # (D, D)       bf16   gcn.dynamic_weight weight, transposed
    bdw_ref,      # (1, D)       f32
    wll_ref,      # (N, D)       f32    last_linear weight
    bll_ref,      # (N, 1)       f32    last_linear bias
    out1_ref,     # (bt, 1, N)   f32
    out2_ref,     # (bt, N, 1)   f32
):
    f32, bf16 = jnp.float32, jnp.bfloat16
    bt = x_ref.shape[0]
    D = bct_ref.shape[1]

    def leaky(t):
        return jnp.where(t > 0, t, LEAKY_SLOPE * t)

    nt = (((1,), (1,)), ((), ()))   # contract last dims of both:  a @ b.T
    tn = (((0,), (0,)), ((), ()))   # contract first dims of both: a.T @ b

    wcat = wcat_ref[...]
    bct, bsw, bg = bct_ref[...], bsw_ref[...], bg_ref[...]
    bns, bnb = bns_ref[...], bnb_ref[...]
    adjs, wswT, wgT = adjs_ref[...], wswT_ref[...], wgT_ref[...]
    wcc1T, wcc2T, bcc = wcc1T_ref[...], wcc2T_ref[...], bcc_ref[...]
    wdwT, bdw = wdwT_ref[...], bdw_ref[...]
    wll, bll = wll_ref[...], bll_ref[...]

    # Static unroll over the per-step batch tile; each sample's outputs are
    # stored immediately so the live set per iteration stays small.
    # TODO(synk): switch to lax.fori_loop(..., unroll=True) with dynamic dim-0
    #             indexing if bt is ever scaled far beyond a handful of samples.
    for b in range(bt):
        x_b = x_ref[b]                                               # (HW, Cf) bf16

        # Fused fc + conv_transform 1x1 convs: one matmul per sample.
        proj = jax.lax.dot_general(x_b, wcat, nt,
                                   preferred_element_type=f32)       # (HW, D+N)
        xt = proj[:, :D] + bct                                       # (HW, D)
        scores = proj[:, D:]                                         # (HW, N)

        # out1: topk(1).mean over spatial == max over spatial.
        out1_ref[b] = jnp.max(scores, axis=0, keepdims=True)         # (1, N)

        # ---- SAM; v kept as (N, D) so D stays on the lane axis ----
        mask = jax.nn.sigmoid(scores)                                # (HW, N) f32
        v = jax.lax.dot_general(mask.astype(bf16), xt.astype(bf16), tn,
                                preferred_element_type=f32)          # (N, D)

        # ---- static GCN ----
        t1 = leaky(jnp.dot(adjs, v.astype(bf16),
                           preferred_element_type=f32))              # (N, D)
        out_static = leaky(jnp.dot(t1.astype(bf16), wswT,
                                   preferred_element_type=f32) + bsw)
        x1 = v + out_static                                          # (N, D)
        x1_bf = x1.astype(bf16)

        # ---- dynamic graph construction (eval-mode BN folded to scale/shift) ----
        x_glb = jnp.mean(x1, axis=0, keepdims=True)                  # (1, D)
        g = jnp.dot(x_glb.astype(bf16), wgT,
                    preferred_element_type=f32) + bg                 # (1, D)
        g = leaky(g * bns + bnb)
        adj_row = jnp.dot(g.astype(bf16), wcc1T,
                          preferred_element_type=f32) + bcc          # (1, N)
        adj_pre_t = jnp.dot(x1_bf, wcc2T,
                            preferred_element_type=f32) + adj_row    # (N, N) = adj^T
        dyn_t = jax.nn.sigmoid(adj_pre_t)                            # dynamic_adj^T

        # ---- dynamic GCN ----
        x2 = leaky(jnp.dot(dyn_t.astype(bf16), x1_bf,
                           preferred_element_type=f32))              # (N, D)
        z = leaky(jnp.dot(x2.astype(bf16), wdwT,
                          preferred_element_type=f32) + bdw)         # (N, D)

        # ---- residual + last_linear; mask_mat is the detached identity, so only
        # the diagonal survives: out2[n] = sum_d w_ll[n, d] * (v + z)[n, d] + b_ll[n]
        z2 = v + z                                                   # (N, D)
        out2_ref[b] = jnp.sum(wll * z2, axis=1, keepdims=True) + bll  # (N, 1)


def origin_add_gcn_forward(x_feat, p, block_batch=None):
    """x_feat: (B, Cf, H, W) post-backbone feature map (NCHW). Returns (out1, out2)."""
    B, Cf, H, W = x_feat.shape
    HW = H * W
    N = p["w_fc"].shape[0]
    D = p["w_ct"].shape[0]
    # v7x has 2 TensorCores: pick block_batch so the grid length is >= 2 (and even).
    bt = 1 if block_batch is None else int(block_batch)
    assert B % bt == 0, "block_batch must divide the batch size"
    grid_len = B // bt
    f32, bf16 = jnp.float32, jnp.bfloat16

    # The in-kernel out2 shortcut (diagonal-only reduction) is valid only for the
    # identity mask_mat the PyTorch module initialises and detach()es.
    if "mask_mat" in p:
        mm = np.asarray(p["mask_mat"])
        if not np.allclose(mm, np.eye(mm.shape[0]), rtol=0.0, atol=0.0):
            raise ValueError("ORIGIN_ADD_GCN kernel requires mask_mat == identity "
                             "(the module's detached buffer).")

    # Glue: NCHW -> (B, HW, Cf) channels-last, bf16 (f32 MXU accumulation in-kernel).
    x_sp = jnp.transpose(x_feat.reshape(B, Cf, HW), (0, 2, 1)).astype(bf16)

    # Fold eval-mode BatchNorm1d into a scale/shift pair.
    bn_scale = (p["bn_gamma"] * jax.lax.rsqrt(p["bn_rv"] + BN_EPS)).astype(f32)
    bn_shift = (p["bn_beta"] - p["bn_rm"] * bn_scale).astype(f32)

    # Fused 1x1-conv weight: conv_transform rows first so the D-slice is lane aligned.
    w_cat = jnp.concatenate([p["w_ct"], p["w_fc"]], axis=0).astype(bf16)   # (D+N, Cf)

    row = lambda a: a.reshape(1, -1).astype(f32)
    ins = [
        x_sp,                                  # (B, HW, Cf) bf16
        w_cat,                                 # (D+N, Cf)   bf16
        row(p["b_ct"]),                        # (1, D)
        p["adj_s"].astype(bf16),               # (N, N)
        p["w_sw"].T.astype(bf16),              # (D, D)
        row(p["b_sw"]),                        # (1, D)
        p["w_g"].T.astype(bf16),               # (D, D)
        row(p["b_g"]),                         # (1, D)
        row(bn_scale), row(bn_shift),          # (1, D) each
        p["w_cc1"].T.astype(bf16),             # (D, N)
        p["w_cc2"].T.astype(bf16),             # (D, N)
        row(p["b_cc"]),                        # (1, N)
        p["w_dw"].T.astype(bf16),              # (D, D)
        row(p["b_dw"]),                        # (1, D)
        p["w_ll"].astype(f32),                 # (N, D)
        p["b_ll"].reshape(-1, 1).astype(f32),  # (N, 1)
    ]

    # VMEM budget: 2x-buffered weights + double-buffered x tile / outputs + the
    # unrolled per-sample intermediates, capped with headroom below physical
    # capacity (important on v7x with 64 MiB/TC).
    weight_bytes = sum(int(a.size) * a.dtype.itemsize for a in ins[1:])
    x_tile_bytes = bt * HW * Cf * 2
    out_tile_bytes = 2 * bt * N * 4
    interm_bytes = bt * (HW * (D + N) * 6 + 8 * N * D * 4 + 2 * N * N * 4)
    needed = int(1.25 * (2 * weight_bytes + 2 * x_tile_bytes
                         + 2 * out_tile_bytes + interm_bytes))
    try:
        cap = int(0.85 * pltpu.get_tpu_info().vmem_capacity_bytes)
    except Exception:  # capability probe only (never masks kernel errors)
        cap = 48 * 1024 * 1024  # safe on v5e / v6e / v7x
    vmem_limit = int(min(max(needed, 32 * 1024 * 1024), cap))

    const2d = lambda a: pl.BlockSpec(a.shape, lambda b: (0, 0))
    in_specs = ([pl.BlockSpec((bt, HW, Cf), lambda b: (b, 0, 0))]
                + [const2d(a) for a in ins[1:]])
    out_specs = (pl.BlockSpec((bt, 1, N), lambda b: (b, 0, 0)),
                 pl.BlockSpec((bt, N, 1), lambda b: (b, 0, 0)))
    out_shape = (jax.ShapeDtypeStruct((B, 1, N), f32),
                 jax.ShapeDtypeStruct((B, N, 1), f32))

    out1, out2 = pl.pallas_call(
        _origin_add_gcn_kernel,
        grid=(grid_len,),
        in_specs=in_specs,
        out_specs=out_specs,
        out_shape=out_shape,
        compiler_params=pltpu.CompilerParams(
            dimension_semantics=("parallel",),
            vmem_limit_bytes=vmem_limit),
    )(*ins)
    return out1[:, 0, :], out2[:, :, 0]


def init_params(key, num_classes, feat_channels, hidden):
    """Deterministic synthetic parameters (shapes follow the PyTorch module)."""
    N, Cf, D = num_classes, feat_channels, hidden
    ks = jax.random.split(key, 19)
    r = lambda k, shape, scale=0.1: scale * jax.random.normal(k, shape, jnp.float32)
    return dict(
        w_fc=r(ks[0], (N, Cf)),                  # fc Conv2d(Cf, N, 1x1, bias=False)
        w_ct=r(ks[1], (D, Cf)), b_ct=r(ks[2], (D,)),   # conv_transform
        adj_s=r(ks[3], (N, N)),                  # static_adj Conv1d(N, N, 1, no bias)
        w_sw=r(ks[4], (D, D)), b_sw=r(ks[5], (D,)),    # static_weight
        w_g=r(ks[6], (D, D)), b_g=r(ks[7], (D,)),      # conv_global
        bn_gamma=1.0 + r(ks[8], (D,)),
        bn_beta=r(ks[9], (D,)),
        bn_rm=r(ks[10], (D,)),
        bn_rv=1.0 + 0.1 * jax.random.uniform(ks[11], (D,), jnp.float32),
        w_cc1=r(ks[12], (N, D)),                 # conv_create_co_mat cols [:D] (global)
        w_cc2=r(ks[13], (N, D)),                 # conv_create_co_mat cols [D:] (local)
        b_cc=r(ks[14], (N,)),
        w_dw=r(ks[15], (D, D)), b_dw=r(ks[16], (D,)),  # dynamic_weight
        w_ll=r(ks[17], (N, D)), b_ll=r(ks[18], (N,)),  # last_linear
        mask_mat=jnp.eye(N, dtype=jnp.float32),
    )


def reference_forward(x_feat, p):
    """Pure-JAX reference mirroring the PyTorch forward (eval-mode BN).

    Every matmul operand is rounded through bf16 exactly where the kernel feeds
    bf16 to the MXU (f32 accumulation), so the comparison is tight."""
    B, Cf, H, W = x_feat.shape
    HW = H * W
    f32 = jnp.float32
    hi = jax.lax.Precision.HIGHEST
    r = lambda a: a.astype(jnp.bfloat16).astype(f32)
    leaky = lambda t: jnp.where(t > 0, t, LEAKY_SLOPE * t)
    col = lambda a: a[None, :, None]

    x = r(x_feat).reshape(B, Cf, HW)

    scores = jnp.einsum('nc,bch->bnh', r(p['w_fc']), x, precision=hi)        # (B,N,HW)
    out1 = jnp.max(scores, axis=-1)                                          # (B,N)

    mask = jnp.transpose(jax.nn.sigmoid(scores), (0, 2, 1))                  # (B,HW,N)
    x_t = jnp.einsum('dc,bch->bdh', r(p['w_ct']), x, precision=hi) + col(p['b_ct'])
    v = jnp.einsum('bdh,bhn->bdn', r(x_t), r(mask), precision=hi)            # (B,D,N)

    # static GCN
    t1 = leaky(jnp.einsum('ij,bdj->bdi', r(p['adj_s']), r(v), precision=hi))
    out_static = leaky(jnp.einsum('ed,bdn->ben', r(p['w_sw']), r(t1), precision=hi)
                       + col(p['b_sw']))
    x1 = v + out_static                                                      # (B,D,N)

    # dynamic graph construction
    x_glb = jnp.mean(x1, axis=-1, keepdims=True)                             # (B,D,1)
    g = jnp.einsum('ed,bdo->beo', r(p['w_g']), r(x_glb), precision=hi) + col(p['b_g'])
    g = (g - col(p['bn_rm'])) * col(p['bn_gamma']) / jnp.sqrt(
        col(p['bn_rv']) + BN_EPS) + col(p['bn_beta'])
    g = leaky(g)
    adj_pre = (jnp.einsum('nd,bdo->bno', r(p['w_cc1']), r(g), precision=hi)
               + jnp.einsum('nd,bdk->bnk', r(p['w_cc2']), r(x1), precision=hi)
               + col(p['b_cc']))
    dyn = jax.nn.sigmoid(adj_pre)                                            # (B,N,N)

    # dynamic GCN
    x2 = leaky(jnp.einsum('bdn,bnm->bdm', r(x1), r(dyn), precision=hi))
    z = leaky(jnp.einsum('ed,bdm->bem', r(p['w_dw']), r(x2), precision=hi)
              + col(p['b_dw']))

    z2 = v + z
    out2_full = jnp.einsum('nd,bdm->bnm', p['w_ll'], z2, precision=hi) + col(p['b_ll'])
    out2 = jnp.sum(out2_full * p['mask_mat'][None], axis=-1)                 # (B,N)
    return out1, out2


if __name__ == "__main__":
    key = jax.random.PRNGKey(0)
    # Small stand-in shapes: Cf plays the role of 2048, D of 1024, N of num_classes.
    B, Cf, H, W = 4, 32, 4, 4
    D, N = 16, 8     # hidden dim, num_classes

    k_x, k_p = jax.random.split(key)
    x_feat = jax.random.normal(k_x, (B, Cf, H, W), jnp.float32)
    params = init_params(k_p, num_classes=N, feat_channels=Cf, hidden=D)

    out1, out2 = origin_add_gcn_forward(x_feat, params, block_batch=2)
    jax.block_until_ready((out1, out2))

    r1, r2 = reference_forward(x_feat, params)
    np.testing.assert_allclose(np.asarray(out1), np.asarray(r1), rtol=5e-3, atol=5e-3)
    np.testing.assert_allclose(np.asarray(out2), np.asarray(r2), rtol=5e-3, atol=5e-3)

    print("KERNEL_OK")
</pallas_src>

<mosaic_0001>
module attributes {stable_mosaic.version = 11 : i64} {
  func.func @_origin_add_gcn_kernel(%arg0: i32, %arg1: memref<2x16x32xbf16, #tpu.memory_space<vmem>>, %arg2: memref<24x32xbf16, #tpu.memory_space<vmem>>, %arg3: memref<1x16xf32, #tpu.memory_space<vmem>>, %arg4: memref<8x8xbf16, #tpu.memory_space<vmem>>, %arg5: memref<16x16xbf16, #tpu.memory_space<vmem>>, %arg6: memref<1x16xf32, #tpu.memory_space<vmem>>, %arg7: memref<16x16xbf16, #tpu.memory_space<vmem>>, %arg8: memref<1x16xf32, #tpu.memory_space<vmem>>, %arg9: memref<1x16xf32, #tpu.memory_space<vmem>>, %arg10: memref<1x16xf32, #tpu.memory_space<vmem>>, %arg11: memref<16x8xbf16, #tpu.memory_space<vmem>>, %arg12: memref<16x8xbf16, #tpu.memory_space<vmem>>, %arg13: memref<1x8xf32, #tpu.memory_space<vmem>>, %arg14: memref<16x16xbf16, #tpu.memory_space<vmem>>, %arg15: memref<1x16xf32, #tpu.memory_space<vmem>>, %arg16: memref<8x16xf32, #tpu.memory_space<vmem>>, %arg17: memref<8x1xf32, #tpu.memory_space<vmem>>, %arg18: memref<2x1x8xf32, #tpu.memory_space<vmem>>, %arg19: memref<2x8x1xf32, #tpu.memory_space<vmem>>) attributes {dimension_semantics = [#tpu.dimension_semantics<parallel>], iteration_bounds = array<i64: 2>, scalar_prefetch = 0 : i64, scratch_operands = 0 : i64, tpu.core_type = #tpu.core_type<tc>, window_params = [{transform_indices = @transform_0, window_bounds = array<i64: 2, 16, 32>}, {pipeline_mode = #tpu.pipeline_mode<synchronous>, transform_indices = @transform_1, window_bounds = array<i64: 24, 32>}, {pipeline_mode = #tpu.pipeline_mode<synchronous>, transform_indices = @transform_2, window_bounds = array<i64: 1, 16>}, {pipeline_mode = #tpu.pipeline_mode<synchronous>, transform_indices = @transform_3, window_bounds = array<i64: 8, 8>}, {pipeline_mode = #tpu.pipeline_mode<synchronous>, transform_indices = @transform_4, window_bounds = array<i64: 16, 16>}, {pipeline_mode = #tpu.pipeline_mode<synchronous>, transform_indices = @transform_5, window_bounds = array<i64: 1, 16>}, {pipeline_mode = #tpu.pipeline_mode<synchronous>, transform_indices = @transform_6, window_bounds = array<i64: 16, 16>}, {pipeline_mode = #tpu.pipeline_mode<synchronous>, transform_indices = @transform_7, window_bounds = array<i64: 1, 16>}, {pipeline_mode = #tpu.pipeline_mode<synchronous>, transform_indices = @transform_8, window_bounds = array<i64: 1, 16>}, {pipeline_mode = #tpu.pipeline_mode<synchronous>, transform_indices = @transform_9, window_bounds = array<i64: 1, 16>}, {pipeline_mode = #tpu.pipeline_mode<synchronous>, transform_indices = @transform_10, window_bounds = array<i64: 16, 8>}, {pipeline_mode = #tpu.pipeline_mode<synchronous>, transform_indices = @transform_11, window_bounds = array<i64: 16, 8>}, {pipeline_mode = #tpu.pipeline_mode<synchronous>, transform_indices = @transform_12, window_bounds = array<i64: 1, 8>}, {pipeline_mode = #tpu.pipeline_mode<synchronous>, transform_indices = @transform_13, window_bounds = array<i64: 16, 16>}, {pipeline_mode = #tpu.pipeline_mode<synchronous>, transform_indices = @transform_14, window_bounds = array<i64: 1, 16>}, {pipeline_mode = #tpu.pipeline_mode<synchronous>, transform_indices = @transform_15, window_bounds = array<i64: 8, 16>}, {pipeline_mode = #tpu.pipeline_mode<synchronous>, transform_indices = @transform_16, window_bounds = array<i64: 8, 1>}, {transform_indices = @transform_17, window_bounds = array<i64: 2, 1, 8>}, {transform_indices = @transform_18, window_bounds = array<i64: 2, 8, 1>}]} {
    %c0 = arith.constant 0 : index
    %c0_0 = arith.constant 0 : index
    %0 = vector.load %arg2[%c0, %c0_0] : memref<24x32xbf16, #tpu.memory_space<vmem>>, vector<24x32xbf16>
    %c0_1 = arith.constant 0 : index
    %c0_2 = arith.constant 0 : index
    %1 = vector.load %arg3[%c0_1, %c0_2] : memref<1x16xf32, #tpu.memory_space<vmem>>, vector<1x16xf32>
    %c0_3 = arith.constant 0 : index
    %c0_4 = arith.constant 0 : index
    %2 = vector.load %arg6[%c0_3, %c0_4] : memref<1x16xf32, #tpu.memory_space<vmem>>, vector<1x16xf32>
    %c0_5 = arith.constant 0 : index
    %c0_6 = arith.constant 0 : index
    %3 = vector.load %arg8[%c0_5, %c0_6] : memref<1x16xf32, #tpu.memory_space<vmem>>, vector<1x16xf32>
    %c0_7 = arith.constant 0 : index
    %c0_8 = arith.constant 0 : index
    %4 = vector.load %arg9[%c0_7, %c0_8] : memref<1x16xf32, #tpu.memory_space<vmem>>, vector<1x16xf32>
    %c0_9 = arith.constant 0 : index
    %c0_10 = arith.constant 0 : index
    %5 = vector.load %arg10[%c0_9, %c0_10] : memref<1x16xf32, #tpu.memory_space<vmem>>, vector<1x16xf32>
    %c0_11 = arith.constant 0 : index
    %c0_12 = arith.constant 0 : index
    %6 = vector.load %arg4[%c0_11, %c0_12] : memref<8x8xbf16, #tpu.memory_space<vmem>>, vector<8x8xbf16>
    %c0_13 = arith.constant 0 : index
    %c0_14 = arith.constant 0 : index
    %7 = vector.load %arg5[%c0_13, %c0_14] : memref<16x16xbf16, #tpu.memory_space<vmem>>, vector<16x16xbf16>
    %c0_15 = arith.constant 0 : index
    %c0_16 = arith.constant 0 : index
    %8 = vector.load %arg7[%c0_15, %c0_16] : memref<16x16xbf16, #tpu.memory_space<vmem>>, vector<16x16xbf16>
    %c0_17 = arith.constant 0 : index
    %c0_18 = arith.constant 0 : index
    %9 = vector.load %arg11[%c0_17, %c0_18] : memref<16x8xbf16, #tpu.memory_space<vmem>>, vector<16x8xbf16>
    %c0_19 = arith.constant 0 : index
    %c0_20 = arith.constant 0 : index
    %10 = vector.load %arg12[%c0_19, %c0_20] : memref<16x8xbf16, #tpu.memory_space<vmem>>, vector<16x8xbf16>
    %c0_21 = arith.constant 0 : index
    %c0_22 = arith.constant 0 : index
    %11 = vector.load %arg13[%c0_21, %c0_22] : memref<1x8xf32, #tpu.memory_space<vmem>>, vector<1x8xf32>
    %c0_23 = arith.constant 0 : index
    %c0_24 = arith.constant 0 : index
    %12 = vector.load %arg14[%c0_23, %c0_24] : memref<16x16xbf16, #tpu.memory_space<vmem>>, vector<16x16xbf16>
    %c0_25 = arith.constant 0 : index
    %c0_26 = arith.constant 0 : index
    %13 = vector.load %arg15[%c0_25, %c0_26] : memref<1x16xf32, #tpu.memory_space<vmem>>, vector<1x16xf32>
    %c0_27 = arith.constant 0 : index
    %c0_28 = arith.constant 0 : index
    %14 = vector.load %arg16[%c0_27, %c0_28] : memref<8x16xf32, #tpu.memory_space<vmem>>, vector<8x16xf32>
    %c0_29 = arith.constant 0 : index
    %c0_30 = arith.constant 0 : index
    %15 = vector.load %arg17[%c0_29, %c0_30] : memref<8x1xf32, #tpu.memory_space<vmem>>, vector<8x1xf32>
    %c0_31 = arith.constant 0 : index
    %c0_32 = arith.constant 0 : index
    %c0_33 = arith.constant 0 : index
    %16 = vector.load %arg1[%c0_31, %c0_32, %c0_33] : memref<2x16x32xbf16, #tpu.memory_space<vmem>>, vector<1x16x32xbf16>
    %17 = vector.shape_cast %16 : vector<1x16x32xbf16> to vector<16x32xbf16>
    %cst = arith.constant dense<0.000000e+00> : vector<16x24xf32>
    %18 = tpu.matmul %17, %0, %cst {dimension_numbers = #tpu.dot_dimension_numbers<[1], [1], [0], [0], [0, 0, 1, 0], [], []>} : vector<16x32xbf16>, vector<24x32xbf16>, vector<16x24xf32> -> vector<16x24xf32>
    %19 = vector.extract_strided_slice %18 {offsets = [0, 0], sizes = [16, 16], strides = [1, 1]} : vector<16x24xf32> to vector<16x16xf32>
    %20 = vector.broadcast %1 : vector<1x16xf32> to vector<16x16xf32>
    %21 = arith.addf %19, %20 : vector<16x16xf32>
    %22 = vector.extract_strided_slice %18 {offsets = [0, 16], sizes = [16, 8], strides = [1, 1]} : vector<16x24xf32> to vector<16x8xf32>
    %cst_34 = arith.constant dense<0xFF800000> : vector<8xf32>
    %23 = vector.multi_reduction <maximumf>, %22, %cst_34 [0] : vector<16x8xf32> to vector<8xf32>
    %24 = vector.shape_cast %23 : vector<8xf32> to vector<1x8xf32>
    %c0_35 = arith.constant 0 : index
    %c0_36 = arith.constant 0 : index
    %c0_37 = arith.constant 0 : index
    %25 = vector.load %arg18[%c0_35, %c0_36, %c0_37] : memref<2x1x8xf32, #tpu.memory_space<vmem>>, vector<1x1x8xf32>
    %26 = vector.shape_cast %25 : vector<1x1x8xf32> to vector<1x8xf32>
    %27 = vector.shape_cast %24 : vector<1x8xf32> to vector<1x1x8xf32>
    tpu.vector_store %arg18[%c0_35, %c0_36, %c0_37], %27 {strides = array<i32>} : memref<2x1x8xf32, #tpu.memory_space<vmem>>, vector<1x1x8xf32>,
    %28 = arith.negf %22 : vector<16x8xf32>
    %29 = math.exp %28 : vector<16x8xf32>
    %cst_38 = arith.constant 1.000000e+00 : f32
    %30 = vector.broadcast %cst_38 : f32 to vector<16x8xf32>
    %31 = arith.addf %30, %29 : vector<16x8xf32>
    %32 = arith.divf %30, %31 : vector<16x8xf32>
    %33 = arith.truncf %32 : vector<16x8xf32> to vector<16x8xbf16>
    %34 = arith.truncf %21 : vector<16x16xf32> to vector<16x16xbf16>
    %cst_39 = arith.constant dense<0.000000e+00> : vector<8x16xf32>
    %35 = tpu.matmul %33, %34, %cst_39 {dimension_numbers = #tpu.dot_dimension_numbers<[0], [0], [1], [1], [0, 1, 1, 1], [], []>} : vector<16x8xbf16>, vector<16x16xbf16>, vector<8x16xf32> -> vector<8x16xf32>
    %36 = arith.truncf %35 : vector<8x16xf32> to vector<8x16xbf16>
    %cst_40 = arith.constant dense<0.000000e+00> : vector<8x16xf32>
    %37 = tpu.matmul %6, %36, %cst_40 {dimension_numbers = #tpu.dot_dimension_numbers<[1], [0], [0], [1], [0, 0, 1, 1], [], []>} : vector<8x8xbf16>, vector<8x16xbf16>, vector<8x16xf32> -> vector<8x16xf32>
    %cst_41 = arith.constant 0.000000e+00 : f32
    %38 = vector.broadcast %cst_41 : f32 to vector<8x16xf32>
    %39 = arith.cmpf ogt, %37, %38 : vector<8x16xf32>
    %cst_42 = arith.constant 2.000000e-01 : f32
    %40 = vector.broadcast %cst_42 : f32 to vector<8x16xf32>
    %41 = arith.mulf %40, %37 : vector<8x16xf32>
    %42 = arith.select %39, %37, %41 : vector<8x16xi1>, vector<8x16xf32>
    %43 = arith.truncf %42 : vector<8x16xf32> to vector<8x16xbf16>
    %cst_43 = arith.constant dense<0.000000e+00> : vector<8x16xf32>
    %44 = tpu.matmul %43, %7, %cst_43 {dimension_numbers = #tpu.dot_dimension_numbers<[1], [0], [0], [1], [0, 0, 1, 1], [], []>} : vector<8x16xbf16>, vector<16x16xbf16>, vector<8x16xf32> -> vector<8x16xf32>
    %45 = vector.broadcast %2 : vector<1x16xf32> to vector<8x16xf32>
    %46 = arith.addf %44, %45 : vector<8x16xf32>
    %cst_44 = arith.constant 0.000000e+00 : f32
    %47 = vector.broadcast %cst_44 : f32 to vector<8x16xf32>
    %48 = arith.cmpf ogt, %46, %47 : vector<8x16xf32>
    %cst_45 = arith.constant 2.000000e-01 : f32
    %49 = vector.broadcast %cst_45 : f32 to vector<8x16xf32>
    %50 = arith.mulf %49, %46 : vector<8x16xf32>
    %51 = arith.select %48, %46, %50 : vector<8x16xi1>, vector<8x16xf32>
    %52 = arith.addf %35, %51 : vector<8x16xf32>
    %53 = arith.truncf %52 : vector<8x16xf32> to vector<8x16xbf16>
    %cst_46 = arith.constant dense<0.000000e+00> : vector<16xf32>
    %54 = vector.multi_reduction <add>, %52, %cst_46 [0] : vector<8x16xf32> to vector<16xf32>
    %55 = vector.shape_cast %54 : vector<16xf32> to vector<1x16xf32>
    %cst_47 = arith.constant 8.000000e+00 : f32
    %56 = vector.broadcast %cst_47 : f32 to vector<1x16xf32>
    %57 = arith.divf %55, %56 : vector<1x16xf32>
    %58 = arith.truncf %57 : vector<1x16xf32> to vector<1x16xbf16>
    %cst_48 = arith.constant dense<0.000000e+00> : vector<1x16xf32>
    %59 = tpu.matmul %58, %8, %cst_48 {dimension_numbers = #tpu.dot_dimension_numbers<[1], [0], [0], [1], [0, 0, 1, 1], [], []>} : vector<1x16xbf16>, vector<16x16xbf16>, vector<1x16xf32> -> vector<1x16xf32>
    %60 = arith.addf %59, %3 : vector<1x16xf32>
    %61 = arith.mulf %60, %4 : vector<1x16xf32>
    %62 = arith.addf %61, %5 : vector<1x16xf32>
    %cst_49 = arith.constant 0.000000e+00 : f32
    %63 = vector.broadcast %cst_49 : f32 to vector<1x16xf32>
    %64 = arith.cmpf ogt, %62, %63 : vector<1x16xf32>
    %cst_50 = arith.constant 2.000000e-01 : f32
    %65 = vector.broadcast %cst_50 : f32 to vector<1x16xf32>
    %66 = arith.mulf %65, %62 : vector<1x16xf32>
    %67 = arith.select %64, %62, %66 : vector<1x16xi1>, vector<1x16xf32>
    %68 = arith.truncf %67 : vector<1x16xf32> to vector<1x16xbf16>
    %cst_51 = arith.constant dense<0.000000e+00> : vector<1x8xf32>
    %69 = tpu.matmul %68, %9, %cst_51 {dimension_numbers = #tpu.dot_dimension_numbers<[1], [0], [0], [1], [0, 0, 1, 1], [], []>} : vector<1x16xbf16>, vector<16x8xbf16>, vector<1x8xf32> -> vector<1x8xf32>
    %70 = arith.addf %69, %11 : vector<1x8xf32>
    %cst_52 = arith.constant dense<0.000000e+00> : vector<8x8xf32>
    %71 = tpu.matmul %53, %10, %cst_52 {dimension_numbers = #tpu.dot_dimension_numbers<[1], [0], [0], [1], [0, 0, 1, 1], [], []>} : vector<8x16xbf16>, vector<16x8xbf16>, vector<8x8xf32> -> vector<8x8xf32>
    %72 = vector.broadcast %70 : vector<1x8xf32> to vector<8x8xf32>
    %73 = arith.addf %71, %72 : vector<8x8xf32>
    %74 = arith.negf %73 : vector<8x8xf32>
    %75 = math.exp %74 : vector<8x8xf32>
    %cst_53 = arith.constant 1.000000e+00 : f32
    %76 = vector.broadcast %cst_53 : f32 to vector<8x8xf32>
    %77 = arith.addf %76, %75 : vector<8x8xf32>
    %78 = arith.divf %76, %77 : vector<8x8xf32>
    %79 = arith.truncf %78 : vector<8x8xf32> to vector<8x8xbf16>
    %cst_54 = arith.constant dense<0.000000e+00> : vector<8x16xf32>
    %80 = tpu.matmul %79, %53, %cst_54 {dimension_numbers = #tpu.dot_dimension_numbers<[1], [0], [0], [1], [0, 0, 1, 1], [], []>} : vector<8x8xbf16>, vector<8x16xbf16>, vector<8x16xf32> -> vector<8x16xf32>
    %cst_55 = arith.constant 0.000000e+00 : f32
    %81 = vector.broadcast %cst_55 : f32 to vector<8x16xf32>
    %82 = arith.cmpf ogt, %80, %81 : vector<8x16xf32>
    %cst_56 = arith.constant 2.000000e-01 : f32
    %83 = vector.broadcast %cst_56 : f32 to vector<8x16xf32>
    %84 = arith.mulf %83, %80 : vector<8x16xf32>
    %85 = arith.select %82, %80, %84 : vector<8x16xi1>, vector<8x16xf32>
    %86 = arith.truncf %85 : vector<8x16xf32> to vector<8x16xbf16>
    %cst_57 = arith.constant dense<0.000000e+00> : vector<8x16xf32>
    %87 = tpu.matmul %86, %12, %cst_57 {dimension_numbers = #tpu.dot_dimension_numbers<[1], [0], [0], [1], [0, 0, 1, 1], [], []>} : vector<8x16xbf16>, vector<16x16xbf16>, vector<8x16xf32> -> vector<8x16xf32>
    %88 = vector.broadcast %13 : vector<1x16xf32> to vector<8x16xf32>
    %89 = arith.addf %87, %88 : vector<8x16xf32>
    %cst_58 = arith.constant 0.000000e+00 : f32
    %90 = vector.broadcast %cst_58 : f32 to vector<8x16xf32>
    %91 = arith.cmpf ogt, %89, %90 : vector<8x16xf32>
    %cst_59 = arith.constant 2.000000e-01 : f32
    %92 = vector.broadcast %cst_59 : f32 to vector<8x16xf32>
    %93 = arith.mulf %92, %89 : vector<8x16xf32>
    %94 = arith.select %91, %89, %93 : vector<8x16xi1>, vector<8x16xf32>
    %95 = arith.addf %35, %94 : vector<8x16xf32>
    %96 = arith.mulf %14, %95 : vector<8x16xf32>
    %cst_60 = arith.constant dense<0.000000e+00> : vector<8xf32>
    %97 = vector.multi_reduction <add>, %96, %cst_60 [1] : vector<8x16xf32> to vector<8xf32>
    %98 = vector.shape_cast %97 : vector<8xf32> to vector<8x1xf32>
    %99 = arith.addf %98, %15 : vector<8x1xf32>
    %c0_61 = arith.constant 0 : index
    %c0_62 = arith.constant 0 : index
    %c0_63 = arith.constant 0 : index
    %100 = vector.load %arg19[%c0_61, %c0_62, %c0_63] : memref<2x8x1xf32, #tpu.memory_space<vmem>>, vector<1x8x1xf32>
    %101 = vector.shape_cast %100 : vector<1x8x1xf32> to vector<8x1xf32>
    %102 = vector.shape_cast %99 : vector<8x1xf32> to vector<1x8x1xf32>
    tpu.vector_store %arg19[%c0_61, %c0_62, %c0_63], %102 {strides = array<i32>} : memref<2x8x1xf32, #tpu.memory_space<vmem>>, vector<1x8x1xf32>,
    %c1 = arith.constant 1 : index
    %c0_64 = arith.constant 0 : index
    %c0_65 = arith.constant 0 : index
    %103 = vector.load %arg1[%c1, %c0_64, %c0_65] : memref<2x16x32xbf16, #tpu.memory_space<vmem>>, vector<1x16x32xbf16>
    %104 = vector.shape_cast %103 : vector<1x16x32xbf16> to vector<16x32xbf16>
    %cst_66 = arith.constant dense<0.000000e+00> : vector<16x24xf32>
    %105 = tpu.matmul %104, %0, %cst_66 {dimension_numbers = #tpu.dot_dimension_numbers<[1], [1], [0], [0], [0, 0, 1, 0], [], []>} : vector<16x32xbf16>, vector<24x32xbf16>, vector<16x24xf32> -> vector<16x24xf32>
    %106 = vector.extract_strided_slice %105 {offsets = [0, 0], sizes = [16, 16], strides = [1, 1]} : vector<16x24xf32> to vector<16x16xf32>
    %107 = vector.broadcast %1 : vector<1x16xf32> to vector<16x16xf32>
    %108 = arith.addf %106, %107 : vector<16x16xf32>
    %109 = vector.extract_strided_slice %105 {offsets = [0, 16], sizes = [16, 8], strides = [1, 1]} : vector<16x24xf32> to vector<16x8xf32>
    %cst_67 = arith.constant dense<0xFF800000> : vector<8xf32>
    %110 = vector.multi_reduction <maximumf>, %109, %cst_67 [0] : vector<16x8xf32> to vector<8xf32>
    %111 = vector.shape_cast %110 : vector<8xf32> to vector<1x8xf32>
    %c1_68 = arith.constant 1 : index
    %c0_69 = arith.constant 0 : index
    %c0_70 = arith.constant 0 : index
    %112 = vector.load %arg18[%c1_68, %c0_69, %c0_70] : memref<2x1x8xf32, #tpu.memory_space<vmem>>, vector<1x1x8xf32>
    %113 = vector.shape_cast %112 : vector<1x1x8xf32> to vector<1x8xf32>
    %114 = vector.shape_cast %111 : vector<1x8xf32> to vector<1x1x8xf32>
    tpu.vector_store %arg18[%c1_68, %c0_69, %c0_70], %114 {strides = array<i32>} : memref<2x1x8xf32, #tpu.memory_space<vmem>>, vector<1x1x8xf32>,
    %115 = arith.negf %109 : vector<16x8xf32>
    %116 = math.exp %115 : vector<16x8xf32>
    %cst_71 = arith.constant 1.000000e+00 : f32
    %117 = vector.broadcast %cst_71 : f32 to vector<16x8xf32>
    %118 = arith.addf %117, %116 : vector<16x8xf32>
    %119 = arith.divf %117, %118 : vector<16x8xf32>
    %120 = arith.truncf %119 : vector<16x8xf32> to vector<16x8xbf16>
    %121 = arith.truncf %108 : vector<16x16xf32> to vector<16x16xbf16>
    %cst_72 = arith.constant dense<0.000000e+00> : vector<8x16xf32>
    %122 = tpu.matmul %120, %121, %cst_72 {dimension_numbers = #tpu.dot_dimension_numbers<[0], [0], [1], [1], [0, 1, 1, 1], [], []>} : vector<16x8xbf16>, vector<16x16xbf16>, vector<8x16xf32> -> vector<8x16xf32>
    %123 = arith.truncf %122 : vector<8x16xf32> to vector<8x16xbf16>
    %cst_73 = arith.constant dense<0.000000e+00> : vector<8x16xf32>
    %124 = tpu.matmul %6, %123, %cst_73 {dimension_numbers = #tpu.dot_dimension_numbers<[1], [0], [0], [1], [0, 0, 1, 1], [], []>} : vector<8x8xbf16>, vector<8x16xbf16>, vector<8x16xf32> -> vector<8x16xf32>
    %cst_74 = arith.constant 0.000000e+00 : f32
    %125 = vector.broadcast %cst_74 : f32 to vector<8x16xf32>
    %126 = arith.cmpf ogt, %124, %125 : vector<8x16xf32>
    %cst_75 = arith.constant 2.000000e-01 : f32
    %127 = vector.broadcast %cst_75 : f32 to vector<8x16xf32>
    %128 = arith.mulf %127, %124 : vector<8x16xf32>
    %129 = arith.select %126, %124, %128 : vector<8x16xi1>, vector<8x16xf32>
    %130 = arith.truncf %129 : vector<8x16xf32> to vector<8x16xbf16>
    %cst_76 = arith.constant dense<0.000000e+00> : vector<8x16xf32>
    %131 = tpu.matmul %130, %7, %cst_76 {dimension_numbers = #tpu.dot_dimension_numbers<[1], [0], [0], [1], [0, 0, 1, 1], [], []>} : vector<8x16xbf16>, vector<16x16xbf16>, vector<8x16xf32> -> vector<8x16xf32>
    %132 = vector.broadcast %2 : vector<1x16xf32> to vector<8x16xf32>
    %133 = arith.addf %131, %132 : vector<8x16xf32>
    %cst_77 = arith.constant 0.000000e+00 : f32
    %134 = vector.broadcast %cst_77 : f32 to vector<8x16xf32>
    %135 = arith.cmpf ogt, %133, %134 : vector<8x16xf32>
    %cst_78 = arith.constant 2.000000e-01 : f32
    %136 = vector.broadcast %cst_78 : f32 to vector<8x16xf32>
    %137 = arith.mulf %136, %133 : vector<8x16xf32>
    %138 = arith.select %135, %133, %137 : vector<8x16xi1>, vector<8x16xf32>
    %139 = arith.addf %122, %138 : vector<8x16xf32>
    %140 = arith.truncf %139 : vector<8x16xf32> to vector<8x16xbf16>
    %cst_79 = arith.constant dense<0.000000e+00> : vector<16xf32>
    %141 = vector.multi_reduction <add>, %139, %cst_79 [0] : vector<8x16xf32> to vector<16xf32>
    %142 = vector.shape_cast %141 : vector<16xf32> to vector<1x16xf32>
    %cst_80 = arith.constant 8.000000e+00 : f32
    %143 = vector.broadcast %cst_80 : f32 to vector<1x16xf32>
    %144 = arith.divf %142, %143 : vector<1x16xf32>
    %145 = arith.truncf %144 : vector<1x16xf32> to vector<1x16xbf16>
    %cst_81 = arith.constant dense<0.000000e+00> : vector<1x16xf32>
    %146 = tpu.matmul %145, %8, %cst_81 {dimension_numbers = #tpu.dot_dimension_numbers<[1], [0], [0], [1], [0, 0, 1, 1], [], []>} : vector<1x16xbf16>, vector<16x16xbf16>, vector<1x16xf32> -> vector<1x16xf32>
    %147 = arith.addf %146, %3 : vector<1x16xf32>
    %148 = arith.mulf %147, %4 : vector<1x16xf32>
    %149 = arith.addf %148, %5 : vector<1x16xf32>
    %cst_82 = arith.constant 0.000000e+00 : f32
    %150 = vector.broadcast %cst_82 : f32 to vector<1x16xf32>
    %151 = arith.cmpf ogt, %149, %150 : vector<1x16xf32>
    %cst_83 = arith.constant 2.000000e-01 : f32
    %152 = vector.broadcast %cst_83 : f32 to vector<1x16xf32>
    %153 = arith.mulf %152, %149 : vector<1x16xf32>
    %154 = arith.select %151, %149, %153 : vector<1x16xi1>, vector<1x16xf32>
    %155 = arith.truncf %154 : vector<1x16xf32> to vector<1x16xbf16>
    %cst_84 = arith.constant dense<0.000000e+00> : vector<1x8xf32>
    %156 = tpu.matmul %155, %9, %cst_84 {dimension_numbers = #tpu.dot_dimension_numbers<[1], [0], [0], [1], [0, 0, 1, 1], [], []>} : vector<1x16xbf16>, vector<16x8xbf16>, vector<1x8xf32> -> vector<1x8xf32>
    %157 = arith.addf %156, %11 : vector<1x8xf32>
    %cst_85 = arith.constant dense<0.000000e+00> : vector<8x8xf32>
    %158 = tpu.matmul %140, %10, %cst_85 {dimension_numbers = #tpu.dot_dimension_numbers<[1], [0], [0], [1], [0, 0, 1, 1], [], []>} : vector<8x16xbf16>, vector<16x8xbf16>, vector<8x8xf32> -> vector<8x8xf32>
    %159 = vector.broadcast %157 : vector<1x8xf32> to vector<8x8xf32>
    %160 = arith.addf %158, %159 : vector<8x8xf32>
    %161 = arith.negf %160 : vector<8x8xf32>
    %162 = math.exp %161 : vector<8x8xf32>
    %cst_86 = arith.constant 1.000000e+00 : f32
    %163 = vector.broadcast %cst_86 : f32 to vector<8x8xf32>
    %164 = arith.addf %163, %162 : vector<8x8xf32>
    %165 = arith.divf %163, %164 : vector<8x8xf32>
    %166 = arith.truncf %165 : vector<8x8xf32> to vector<8x8xbf16>
    %cst_87 = arith.constant dense<0.000000e+00> : vector<8x16xf32>
    %167 = tpu.matmul %166, %140, %cst_87 {dimension_numbers = #tpu.dot_dimension_numbers<[1], [0], [0], [1], [0, 0, 1, 1], [], []>} : vector<8x8xbf16>, vector<8x16xbf16>, vector<8x16xf32> -> vector<8x16xf32>
    %cst_88 = arith.constant 0.000000e+00 : f32
    %168 = vector.broadcast %cst_88 : f32 to vector<8x16xf32>
    %169 = arith.cmpf ogt, %167, %168 : vector<8x16xf32>
    %cst_89 = arith.constant 2.000000e-01 : f32
    %170 = vector.broadcast %cst_89 : f32 to vector<8x16xf32>
    %171 = arith.mulf %170, %167 : vector<8x16xf32>
    %172 = arith.select %169, %167, %171 : vector<8x16xi1>, vector<8x16xf32>
    %173 = arith.truncf %172 : vector<8x16xf32> to vector<8x16xbf16>
    %cst_90 = arith.constant dense<0.000000e+00> : vector<8x16xf32>
    %174 = tpu.matmul %173, %12, %cst_90 {dimension_numbers = #tpu.dot_dimension_numbers<[1], [0], [0], [1], [0, 0, 1, 1], [], []>} : vector<8x16xbf16>, vector<16x16xbf16>, vector<8x16xf32> -> vector<8x16xf32>
    %175 = vector.broadcast %13 : vector<1x16xf32> to vector<8x16xf32>
    %176 = arith.addf %174, %175 : vector<8x16xf32>
    %cst_91 = arith.constant 0.000000e+00 : f32
    %177 = vector.broadcast %cst_91 : f32 to vector<8x16xf32>
    %178 = arith.cmpf ogt, %176, %177 : vector<8x16xf32>
    %cst_92 = arith.constant 2.000000e-01 : f32
    %179 = vector.broadcast %cst_92 : f32 to vector<8x16xf32>
    %180 = arith.mulf %179, %176 : vector<8x16xf32>
    %181 = arith.select %178, %176, %180 : vector<8x16xi1>, vector<8x16xf32>
    %182 = arith.addf %122, %181 : vector<8x16xf32>
    %183 = arith.mulf %14, %182 : vector<8x16xf32>
    %cst_93 = arith.constant dense<0.000000e+00> : vector<8xf32>
    %184 = vector.multi_reduction <add>, %183, %cst_93 [1] : vector<8x16xf32> to vector<8xf32>
    %185 = vector.shape_cast %184 : vector<8xf32> to vector<8x1xf32>
    %186 = arith.addf %185, %15 : vector<8x1xf32>
    %c1_94 = arith.constant 1 : index
    %c0_95 = arith.constant 0 : index
    %c0_96 = arith.constant 0 : index
    %187 = vector.load %arg19[%c1_94, %c0_95, %c0_96] : memref<2x8x1xf32, #tpu.memory_space<vmem>>, vector<1x8x1xf32>
    %188 = vector.shape_cast %187 : vector<1x8x1xf32> to vector<8x1xf32>
    %189 = vector.shape_cast %186 : vector<8x1xf32> to vector<1x8x1xf32>
    tpu.vector_store %arg19[%c1_94, %c0_95, %c0_96], %189 {strides = array<i32>} : memref<2x8x1xf32, #tpu.memory_space<vmem>>, vector<1x8x1xf32>,
    return
  }
  func.func @transform_0(%arg0: i32) -> (i32, i32, i32) {
    %c0_i32 = arith.constant 0 : i32
    %c0_i32_0 = arith.constant 0 : i32
    %c0_i32_1 = arith.constant 0 : i32
    return %arg0, %c0_i32, %c0_i32_0 : i32, i32, i32
  }
  func.func @transform_1(%arg0: i32) -> (i32, i32) {
    %c0_i32 = arith.constant 0 : i32
    %c0_i32_0 = arith.constant 0 : i32
    %c0_i32_1 = arith.constant 0 : i32
    return %c0_i32, %c0_i32_0 : i32, i32
  }
  func.func @transform_2(%arg0: i32) -> (i32, i32) {
    %c0_i32 = arith.constant 0 : i32
    %c0_i32_0 = arith.constant 0 : i32
    %c0_i32_1 = arith.constant 0 : i32
    return %c0_i32, %c0_i32_0 : i32, i32
  }
  func.func @transform_3(%arg0: i32) -> (i32, i32) {
    %c0_i32 = arith.constant 0 : i32
    %c0_i32_0 = arith.constant 0 : i32
    %c0_i32_1 = arith.constant 0 : i32
    return %c0_i32, %c0_i32_0 : i32, i32
  }
  func.func @transform_4(%arg0: i32) -> (i32, i32) {
    %c0_i32 = arith.constant 0 : i32
    %c0_i32_0 = arith.constant 0 : i32
    %c0_i32_1 = arith.constant 0 : i32
    return %c0_i32, %c0_i32_0 : i32, i32
  }
  func.func @transform_5(%arg0: i32) -> (i32, i32) {
    %c0_i32 = arith.constant 0 : i32
    %c0_i32_0 = arith.constant 0 : i32
    %c0_i32_1 = arith.constant 0 : i32
    return %c0_i32, %c0_i32_0 : i32, i32
  }
  func.func @transform_6(%arg0: i32) -> (i32, i32) {
    %c0_i32 = arith.constant 0 : i32
    %c0_i32_0 = arith.constant 0 : i32
    %c0_i32_1 = arith.constant 0 : i32
    return %c0_i32, %c0_i32_0 : i32, i32
  }
  func.func @transform_7(%arg0: i32) -> (i32, i32) {
    %c0_i32 = arith.constant 0 : i32
    %c0_i32_0 = arith.constant 0 : i32
    %c0_i32_1 = arith.constant 0 : i32
    return %c0_i32, %c0_i32_0 : i32, i32
  }
  func.func @transform_8(%arg0: i32) -> (i32, i32) {
    %c0_i32 = arith.constant 0 : i32
    %c0_i32_0 = arith.constant 0 : i32
    %c0_i32_1 = arith.constant 0 : i32
    return %c0_i32, %c0_i32_0 : i32, i32
  }
  func.func @transform_9(%arg0: i32) -> (i32, i32) {
    %c0_i32 = arith.constant 0 : i32
    %c0_i32_0 = arith.constant 0 : i32
    %c0_i32_1 = arith.constant 0 : i32
    return %c0_i32, %c0_i32_0 : i32, i32
  }
  func.func @transform_10(%arg0: i32) -> (i32, i32) {
    %c0_i32 = arith.constant 0 : i32
    %c0_i32_0 = arith.constant 0 : i32
    %c0_i32_1 = arith.constant 0 : i32
    return %c0_i32, %c0_i32_0 : i32, i32
  }
  func.func @transform_11(%arg0: i32) -> (i32, i32) {
    %c0_i32 = arith.constant 0 : i32
    %c0_i32_0 = arith.constant 0 : i32
    %c0_i32_1 = arith.constant 0 : i32
    return %c0_i32, %c0_i32_0 : i32, i32
  }
  func.func @transform_12(%arg0: i32) -> (i32, i32) {
    %c0_i32 = arith.constant 0 : i32
    %c0_i32_0 = arith.constant 0 : i32
    %c0_i32_1 = arith.constant 0 : i32
    return %c0_i32, %c0_i32_0 : i32, i32
  }
  func.func @transform_13(%arg0: i32) -> (i32, i32) {
    %c0_i32 = arith.constant 0 : i32
    %c0_i32_0 = arith.constant 0 : i32
    %c0_i32_1 = arith.constant 0 : i32
    return %c0_i32, %c0_i32_0 : i32, i32
  }
  func.func @transform_14(%arg0: i32) -> (i32, i32) {
    %c0_i32 = arith.constant 0 : i32
    %c0_i32_0 = arith.constant 0 : i32
    %c0_i32_1 = arith.constant 0 : i32
    return %c0_i32, %c0_i32_0 : i32, i32
  }
  func.func @transform_15(%arg0: i32) -> (i32, i32) {
    %c0_i32 = arith.constant 0 : i32
    %c0_i32_0 = arith.constant 0 : i32
    %c0_i32_1 = arith.constant 0 : i32
    return %c0_i32, %c0_i32_0 : i32, i32
  }
  func.func @transform_16(%arg0: i32) -> (i32, i32) {
    %c0_i32 = arith.constant 0 : i32
    %c0_i32_0 = arith.constant 0 : i32
    %c0_i32_1 = arith.constant 0 : i32
    return %c0_i32, %c0_i32_0 : i32, i32
  }
  func.func @transform_17(%arg0: i32) -> (i32, i32, i32) {
    %c0_i32 = arith.constant 0 : i32
    %c0_i32_0 = arith.constant 0 : i32
    %c0_i32_1 = arith.constant 0 : i32
    return %arg0, %c0_i32, %c0_i32_0 : i32, i32, i32
  }
  func.func @transform_18(%arg0: i32) -> (i32, i32, i32) {
    %c0_i32 = arith.constant 0 : i32
    %c0_i32_0 = arith.constant 0 : i32
    %c0_i32_1 = arith.constant 0 : i32
    return %arg0, %c0_i32, %c0_i32_0 : i32, i32, i32
  }
}

</mosaic_0001>

<bundles_post_ra>
// kernel: tpu_custom_call.1
= control target key start
LH: loop header
LB: loop body
LE: loop exit
PB: predicated region body
PF: predicated region fallthrough
CT: control target
= control target key end

     0   :  { %s3287_s0 = inlined_call_operand.vmem [shape: bf16[4,16,32], index: 0, kind: input, shape index: {}]   ;;  %s3288_s1 = inlined_call_operand.hbm [shape: bf16[24,32], index: 1, kind: input, shape index: {}]   ;;  %s3289_s2 = inlined_call_operand.hbm [shape: f32[1,16], index: 2, kind: input, shape index: {}]   ;;  %s3290_s3 = inlined_call_operand.hbm [shape: bf16[8,8], index: 3, kind: input, shape index: {}]   ;;  %s3291_s4 = inlined_call_operand.vmem [shape: bf16[16,16], index: 4, kind: input, shape index: {}]   ;;  %s3292_s5 = inlined_call_operand.hbm [shape: f32[1,16], index: 5, kind: input, shape index: {}]   ;;  %s3293_s6 = inlined_call_operand.hbm [shape: bf16[16,16], index: 6, kind: input, shape index: {}]   ;;  %s3294_s7 = inlined_call_operand.hbm [shape: f32[1,16], index: 7, kind: input, shape index: {}]   ;;  %s3295_s8 = inlined_call_operand.hbm [shape: f32[1,16], index: 8, kind: input, shape index: {}]   ;;  %s3296_s9 = inlined_call_operand.hbm [shape: f32[1,16], index: 9, kind: input, shape index: {}]   ;;  %s3297_s10 = inlined_call_operand.vmem [shape: bf16[16,8], index: 10, kind: input, shape index: {}]   ;;  %s3298_s11 = inlined_call_operand.vmem [shape: bf16[16,8], index: 11, kind: input, shape index: {}]   ;;  %s3299_s12 = inlined_call_operand.hbm [shape: f32[1,8], index: 12, kind: input, shape index: {}]   ;;  %s3300_s13 = inlined_call_operand.vmem [shape: bf16[16,16], index: 13, kind: input, shape index: {}]   ;;  %s3301_s14 = inlined_call_operand.vmem [shape: f32[1,16], index: 14, kind: input, shape index: {}]   ;;  %s3302_s15 = inlined_call_operand.vmem [shape: f32[8,16], index: 15, kind: input, shape index: {}]   ;;  %s3303_s16 = inlined_call_operand.vmem [shape: f32[8,1], index: 16, kind: input, shape index: {}]   ;;  %s3304_s17 = inlined_call_operand.hbm [shape: f32[4,1,8], index: 17, kind: output, shape index: {0}]   ;;  %s3305_s18 = inlined_call_operand.vmem [shape: f32[4,8,1], index: 18, kind: output, shape index: {1}]  }
   0x1   :  { %3316 = sst [smem:[#allocation30_spill]] %s3287_s0 }
   0x2   :  { %3317 = sst [smem:[#allocation31_spill]] %s3288_s1 }
   0x3   :  { %3318 = sst [smem:[#allocation32_spill]] %s3289_s2 }
   0x4   :  { %3319 = sst [smem:[#allocation33_spill]] %s3292_s5 }
   0x5   :  { %3320 = sst [smem:[#allocation34_spill]] %s3294_s7 }
   0x6   :  { %3321 = sst [smem:[#allocation35_spill]] %s3304_s17 }
   0x7   :  { %24 = vsyncpa [#allocation3], 0 }
   0x8   :  { %25 = vsyncpa [#allocation6], 0 }
   0x9   :  { %26 = vsyncpa [#allocation9], 0 }
   0xa   :  { %27 = vsyncpa [#allocation12], 0 }
   0xb   :  { %28 = vsyncpa [#allocation15], 0 }
   0xc   :  { %29 = vsyncpa [#allocation4], 0 }
   0xd   :  { %31 = vsyncpa [#allocation4 + $0x1], 0  ;;  %s2827_s27 = smov 0   ;;  %s2829_s28 = smov 0  }
   0xe   :  { %s2831_s29 = smov 0   ;;  %s2833_s30 = smov 0  }
   0xf LB: > { %3322 = sst [smem:[#allocation24_spill]] %s2701_s27  ;;  %s2848_s0 = sadd.s32 4294967295, %s2713_s30   ;;  %s2713_s30 = sphi %s2833_s30, %s3355_s30   ;;  %s2709_s29 = sphi %s2831_s29, %s3357_s29   ;;  %s2705_s28 = sphi %s2829_s28, %s3359_s28   ;;  %s2701_s27 = sphi %s2827_s27, %s3358_s27  }
  0x10   : > { %3323 = sst [smem:[#allocation25_spill]] %s2709_s29  ;;  %s2003_s19 = sadd.s32 4294967294, %s2713_s30  }
  0x11   : > { %3324 = sst [smem:[#allocation26_spill]] %s2713_s30  ;;  %s2852_s1 = sadd.s32 1, %s2713_s30  }
  0x12   : > { %3325 = sst [smem:[#allocation27_spill]] %s2852_s1  ;;  %s406_s20 = sadd.s32 1, %s2709_s29 }
  0x13   : > { %s403_s21 = ssub.s32 %s2713_s30, %s2852_s1  ;;  %p416_p0 = scmp.ne.s32.totalorder %s2709_s29, %s2705_s28 }
  0x14   : > { %p404_p1 = scmp.eq.s32.totalorder %s403_s21, 0  ;;  %p417_p2 = scmp.eq.s32.totalorder %s2848_s0, 1 }
  0x15   : > { %p422_p3 = scmp.ne.s32.totalorder %s2705_s28, %s2701_s27  ;;  %p423_p4 = scmp.eq.s32.totalorder %s2003_s19, 1 }
  0x16   : > { %s2863_s22 = scalar_select %p404_p1, %s2709_s29, %s406_s20  }
  0x17   : > { %p2865_p5 = por %p417_p2, %p416_p0  ;;  %p2869_p6 = por %p423_p4, %p422_p3 }
  0x18   : > { %3326 = sst [smem:[#allocation28_spill]] %s2863_s22  ;;  %p2004_p7 = scmp.ge.s32.totalorder %s2713_s30, 1 }
  0x19   : > { %s3327_s2 = scalar_select %p2865_p5, 1, 0 }
  0x1a   : > { %s3328_s23 = scalar_select %p2869_p6, 1, 0 }
  0x1b   : > { %p456_p8 = scmp.lt.s32.totalorder %s2713_s30, 3  ;;  %p3312_p9 = scmp.eq.s32.totalorder %s2848_s0, 0 }
  0x1c   : > { %3329 = sst [smem:[#allocation29_spill]] %s3328_s23  ;;  %s2715_s25 = smov [#allocation5]  }
  0x1d   : > { %p2876_p10 = pnand %p2004_p7, %p456_p8  ;;  %s482_s26 = sshll.u32 %s2715_s25, 4  ;;  %s483_s26 = int_to_ptr.vmem [resolvable:$true] %s482_s26 }
  0x1e   : > { %s2716_s19 = smov [#allocation8]   ;;  %s2717_s22 = smov [#allocation11]  }
  0x1f   : > { %s3330_s24 = scalar_select %p2876_p10, 1, 0 }
  0x20   : > { %p2266_p11 = pneg %p2876_p10  ;;  %s507_s20 = sshll.u32 %s2716_s19, 4  ;;  %s508_s20 = int_to_ptr.vmem [resolvable:$true] %s507_s20 }
  0x21   : > { %s531_s29 = sshll.u32 %s2717_s22, 4  ;;  %s2410_s25 = scalar_lea.vmem %s483_s26, 16  ;;  %s2888_s29 = int_to_ptr.vmem [resolvable:$true] %s531_s29 }
  0x22   : > { %p2884_p12 = pnand %p3312_p9, %p2266_p11  ;;  %p2411_p0 = scmp.ne.s32.totalorder %s483_s26, %s2410_s25 }
  0x23   : > { %s2417_s19 = scalar_lea.vmem %s483_s26, 32  ;;  %p2418_p3 = scmp.lt.s32.totalorder %s483_s26, %s483_s26 }
  0x24   : > { %p2892_p13 = pneg %p2884_p12  ;;  %p2419_p4 = scmp.lt.s32.totalorder %s2417_s19, %s2410_s25 }
  0x26   : > { %p2413_p1 = pnand %p2411_p0, %p2892_p13  ;;  %p2420_p7 = por %p2419_p4, %p2418_p3 }
  0x28   : > { %p2414_p2 = pneg %p2413_p1 }
  0x2a   : > { %p2421_p8 = pnand %p2420_p7, %p2414_p2 }
  0x2c   : > { %2424 = shalt.err (!%p2421_p8)
}
  0x2d   : > { %s3333_s27 = sld [smem:[#allocation32_spill]]  ;;  %s2436_s30 = scalar_lea.vmem %s508_s20, 16 }
  0x2e   : > { %p2437_p11 = scmp.ne.s32.totalorder %s508_s20, %s2436_s30  ;;  %s2443_s17 = scalar_lea.vmem %s508_s20, 32 }
  0x2f   : > { %p2444_p0 = scmp.lt.s32.totalorder %s508_s20, %s508_s20  ;;  %p2445_p1 = scmp.lt.s32.totalorder %s2443_s17, %s2436_s30 }
  0x30   : > { %p2439_p9 = pnand %p2437_p11, %p2892_p13 }
  0x31   : > { %p2446_p5 = por %p2445_p1, %p2444_p0 }
  0x32   : > { %p2440_p6 = pneg %p2439_p9 }
  0x33   : > { %2272 = dma.hbm_to_vmem [thread:$0]  (!%p2884_p12), %s3333_s27, 16, %s483_s26, [#allocation6]  }
  0x34   : > { %p2447_p10 = pnand %p2446_p5, %p2440_p6 }
  0x36   : > { %2450 = shalt.err (!%p2447_p10)
}
  0x37   : > { %s3334_s5 = sld [smem:[#allocation33_spill]]  ;;  %s2462_s27 = scalar_lea.vmem %s2888_s29, 16 }
  0x38   : > { %p2463_p2 = scmp.ne.s32.totalorder %s2888_s29, %s2462_s27  ;;  %s2469_s17 = scalar_lea.vmem %s2888_s29, 32 }
  0x39   : > { %p2470_p5 = scmp.lt.s32.totalorder %s2888_s29, %s2888_s29  ;;  %p2471_p6 = scmp.lt.s32.totalorder %s2469_s17, %s2462_s27 }
  0x3a   : > { %p2465_p9 = pnand %p2463_p2, %p2892_p13 }
  0x3b   : > { %p2472_p10 = por %p2471_p6, %p2470_p5 }
  0x3c   : > { %p2466_p3 = pneg %p2465_p9 }
  0x3d   : > { %2278 = dma.hbm_to_vmem [thread:$0]  (!%p2884_p12), %s3334_s5, 16, %s508_s20, [#allocation9]  }
  0x3e   : > { %p2473_p4 = pnand %p2472_p10, %p2466_p3 }
  0x40   : > { %2476 = shalt.err (!%p2473_p4)
}
  0x41   : > { %s3335_s7 = sld [smem:[#allocation34_spill]]  ;;  %s2718_s26 = smov [#allocation14]  }
  0x42   : > { %s553_s20 = sshll.u32 %s2718_s26, 4  ;;  %s2719_s22 = smov [#allocation2]   ;;  %s554_s20 = int_to_ptr.vmem [resolvable:$true] %s553_s20 }
  0x43   : > { %s468_s25 = sshll.u32 %s2719_s22, 4  ;;  %s2488_s19 = scalar_lea.vmem %s554_s20, 16  ;;  %s469_s25 = int_to_ptr.vmem [resolvable:$true] %s468_s25 }
  0x44   : > { %p2489_p7 = scmp.ne.s32.totalorder %s554_s20, %s2488_s19  ;;  %s2495_s27 = scalar_lea.vmem %s554_s20, 32 }
  0x45   : > { %p2496_p0 = scmp.lt.s32.totalorder %s554_s20, %s554_s20  ;;  %p2497_p1 = scmp.lt.s32.totalorder %s2495_s27, %s2488_s19 }
  0x46   : > { %p2491_p8 = pnand %p2489_p7, %p2892_p13 }
  0x47   : > { %2284 = dma.hbm_to_vmem [thread:$0]  (!%p2884_p12), %s3335_s7, 16, %s2888_s29, [#allocation12]  }
  0x48   : > { %p2492_p11 = pneg %p2491_p8  ;;  %p2498_p2 = por %p2497_p1, %p2496_p0 }
  0x4a   : > { %p2499_p9 = pnand %p2498_p2, %p2492_p11 }
  0x4c   : > { %2502 = shalt.err (!%p2499_p9)
}
  0x4d   : > { %2290 = dma.hbm_to_vmem [thread:$0]  (!%p2884_p12), %s3296_s9, 16, %s554_s20, [#allocation15]  }
  0x4e   : > { %s2514_s30 = scalar_lea.vmem %s469_s25, 192  ;;  %p2522_p10 = scmp.lt.s32.totalorder %s469_s25, %s469_s25 }
  0x4f   : > { %p2515_p3 = scmp.ne.s32.totalorder %s469_s25, %s2514_s30  ;;  %p2523_p4 = scmp.lt.s32.totalorder %s2514_s30, %s2514_s30 }
  0x51   : > { %p2517_p5 = pnand %p2515_p3, %p2892_p13  ;;  %p2524_p7 = por %p2523_p4, %p2522_p10 }
  0x53   : > { %p2518_p6 = pneg %p2517_p5 }
  0x55   : > { %p2525_p8 = pnand %p2524_p7, %p2518_p6 }
  0x57   : > { %2528 = shalt.err (!%p2525_p8)
}
  0x58   : > { %s2720_s23 = smov 64   ;;  %s2721_s26 = smov 4  }
  0x59   : > { %s3336_s19 = sld [smem:[#allocation31_spill]]  ;;  %s2722_s27 = smov [#allocation7]  }
  0x5a   : > { %s493_s17 = sshll.u32 %s2722_s27, 4  ;;  %s2723_s29 = smov [#allocation10]   ;;  %s494_s17 = int_to_ptr.vmem [resolvable:$true] %s493_s17 }
  0x5b   : > { %s517_s30 = sshll.u32 %s2723_s29, 4  ;;  %s2540_s5 = scalar_lea.vmem %s494_s17, 64  ;;  %s518_s30 = int_to_ptr.vmem [resolvable:$true] %s517_s30 }
  0x5c   : > { %p2541_p11 = scmp.ne.s32.totalorder %s494_s17, %s2540_s5  ;;  %p2548_p2 = scmp.lt.s32.totalorder %s494_s17, %s494_s17 }
  0x5d   : > { %p2549_p9 = scmp.lt.s32.totalorder %s2540_s5, %s2540_s5 }
  0x5e   : > { %p2543_p0 = pnand %p2541_p11, %p2892_p13 }
  0x5f   : > { %2269 = dma.hbm_to_vmem [thread:$0]  (!%p2884_p12), %s3336_s19, 192, %s469_s25, [#allocation3], %s2720_s23, %s2720_s23, %s2721_s26  }
  0x60   : > { %p2544_p1 = pneg %p2543_p0  ;;  %p2550_p3 = por %p2549_p9, %p2548_p2 }
  0x62   : > { %p2551_p5 = pnand %p2550_p3, %p2544_p1 }
  0x64   : > { %2554 = shalt.err (!%p2551_p5)
}
  0x65   : > { %2275 = dma.hbm_to_vmem [thread:$0]  (!%p2884_p12), %s3290_s3, 64, %s494_s17, [#allocation6]  }
  0x66   : > { %s2566_s25 = scalar_lea.vmem %s518_s30, 128  ;;  %p2574_p7 = scmp.lt.s32.totalorder %s518_s30, %s518_s30 }
  0x67   : > { %p2567_p6 = scmp.ne.s32.totalorder %s518_s30, %s2566_s25  ;;  %p2575_p8 = scmp.lt.s32.totalorder %s2566_s25, %s2566_s25 }
  0x69   : > { %p2569_p10 = pnand %p2567_p6, %p2892_p13  ;;  %p2576_p11 = por %p2575_p8, %p2574_p7 }
  0x6b   : > { %p2570_p4 = pneg %p2569_p10 }
  0x6d   : > { %p2577_p0 = pnand %p2576_p11, %p2570_p4 }
  0x6f   : > { %2580 = shalt.err (!%p2577_p0)
}
  0x70   : > { %2281 = dma.hbm_to_vmem [thread:$0]  (!%p2884_p12), %s3293_s6, 128, %s518_s30, [#allocation9], %s2720_s23, %s2720_s23, %s2721_s26  }
  0x71   : > { %s2724_s22 = smov [#allocation13]   ;;  %s2725_s27 = smov [#allocation16]  }
  0x72   : > { %s542_s19 = sshll.u32 %s2724_s22, 4  ;;  %s570_s17 = sshll.u32 %s2725_s27, 4  ;;  %s543_s19 = int_to_ptr.vmem [resolvable:$true] %s542_s19  ;;  %s571_s17 = int_to_ptr.vmem [resolvable:$true] %s570_s17 }
  0x73   : > { %s2592_s29 = scalar_lea.vmem %s543_s19, 16  ;;  %s2599_s20 = scalar_lea.vmem %s543_s19, 32 }
  0x74   : > { %p2593_p1 = scmp.ne.s32.totalorder %s543_s19, %s2592_s29  ;;  %p2600_p3 = scmp.lt.s32.totalorder %s543_s19, %s543_s19 }
  0x75   : > { %p2601_p5 = scmp.lt.s32.totalorder %s2599_s20, %s2592_s29 }
  0x76   : > { %p2595_p2 = pnand %p2593_p1, %p2892_p13 }
  0x77   : > { %p2602_p6 = por %p2601_p5, %p2600_p3 }
  0x78   : > { %p2596_p9 = pneg %p2595_p2 }
  0x7a   : > { %p2603_p10 = pnand %p2602_p6, %p2596_p9 }
  0x7c   : > { %2606 = shalt.err (!%p2603_p10)
}
  0x7d   : > { %2287 = dma.hbm_to_vmem [thread:$0]  (!%p2884_p12), %s3295_s8, 16, %s543_s19, [#allocation12]  }
  0x7e   : > { %s2618_s26 = scalar_lea.vmem %s571_s17, 16  ;;  %s2625_s30 = scalar_lea.vmem %s571_s17, 32 }
  0x7f   : > { %p2619_p4 = scmp.ne.s32.totalorder %s571_s17, %s2618_s26  ;;  %p2626_p11 = scmp.lt.s32.totalorder %s571_s17, %s571_s17 }
  0x80   : > { %p2627_p0 = scmp.lt.s32.totalorder %s2625_s30, %s2618_s26 }
  0x81   : > { %p2621_p7 = pnand %p2619_p4, %p2892_p13 }
  0x82   : > { %p2628_p1 = por %p2627_p0, %p2626_p11 }
  0x83   : > { %p2622_p8 = pneg %p2621_p7 }
  0x85   : > { %p2629_p2 = pnand %p2628_p1, %p2622_p8 }
  0x87   : > { %2632 = shalt.err (!%p2629_p2)
}
  0x88   : > { %2293 = dma.hbm_to_vmem [thread:$0]  (!%p2884_p12), %s3299_s12, 16, %s571_s17, [#allocation15]  }
  0x89   : > { %p3337_p9 = scmp.ne.s32.totalorder %s3330_s24, 0 }
  0x8a   : > { %p3338_p3 = scmp.eq.s32.totalorder (!%p3337_p9), %s2848_s0, 0 }
  0x8b   : > { %605 = sbr.rel (%p3337_p9) target bundleno = 3740 (0xe9c), region = 88 }
  0x90   : > { %2676 = dma.done.wait (%p3338_p3), [#allocation3], 192   ;;  %p3339_p13 = pmov %p3338_p3 }
  0x91   : > { %p3340_p5 = pmov %p3338_p3 }
  0x92   : > { %2678 = vsyncadd (%p3339_p13), [#allocation3], 4294967104 }
  0x93   : > { %2680 = dma.done.wait (%p3340_p5), [#allocation6], 80   ;;  %p3341_p6 = pmov %p3338_p3 }
  0x94   : > { %p3342_p10 = pmov %p3338_p3 }
  0x95   : > { %2682 = vsyncadd (%p3341_p6), [#allocation6], 4294967216 }
  0x96   : > { %2684 = dma.done.wait (%p3342_p10), [#allocation9], 144   ;;  %p3343_p12 = pmov %p3338_p3 }
  0x97   : > { %p3344_p4 = pmov %p3338_p3 }
  0x98   : > { %2686 = vsyncadd (%p3343_p12), [#allocation9], 4294967152 }
  0x99   : > { %2688 = dma.done.wait (%p3344_p4), [#allocation12], 32   ;;  %p3345_p7 = pmov %p3338_p3 }
  0x9a   : > { %p3346_p8 = pmov %p3338_p3 }
  0x9b   : > { %2690 = vsyncadd (%p3345_p7), [#allocation12], 4294967264 }
  0x9c   : > { %2692 = dma.done.wait (%p3346_p8), [#allocation15], 32   ;;  %p3347_p11 = pmov %p3338_p3 }
  0x9d   : > { %s2026_s1 = sshll.u32 %s2848_s0, 1  ;;  %v2726_v0 = vmov 0.0   ;;  %vm2727_vm0 = vmmov 0   ;;  %vm750_vm1 = vcmask 261120   ;;  %v2366_v1 = vld [vmem:[#allocation2 + $0x8] ss:$0 sps:$4 sm:$0xff]  }
  0x9e   : > { %2694 = vsyncadd (%p3347_p11), [#allocation15], 4294967264  ;;  %2116 = vmatprep.subr.bf16.mxu0 %v2726_v0  ;;  %2120 = vmatprep.mubr.msk.bf16.mxu0 %vm2727_vm0, %v2726_v0  ;;  %p698_p0 = scmp.lt.s32.totalorder %s2026_s1, 3  ;;  %s3348_s19 = sld [smem:[#allocation30_spill]]  ;;  %v3011_v2 = vsel %vm750_vm1, %v2366_v1, 0  ;;  %v2367_v3 = vld [vmem:[#allocation2] sm:$0xff]  }
  0x9f   : > { %2124 = vmatprep.subr.bf16.mxu1 %v2726_v0  ;;  %2126 = vmatprep.mubr.msk.bf16.mxu1 %vm2727_vm0, %v2726_v0  ;;  %v3016_v4 = vsel %vm750_vm1, %v2367_v3, 0  ;;  %vm809_vm2 = vcmask 195712   ;;  %v3024_v9 = vld [vmem:[#allocation5] ss:$0 sm:$0xff]  ;;  %s2728_s17 = smov 112   ;;  %vm859_vm3 = vcmask 130048  }
  0xa0   : > { %s3361_s1 = smov (!%p698_p0, %s2026_s1), 3  ;;  %2117 = vmatpush3.bf16.xpose.msra.mxu0 %v3011_v2  ;;  %vm908_vm4 = vcmask 1043456   ;;  %v3042_v33 = vld [vmem:[#allocation7] sm:$0xf]  ;;  %vm904_vm5 = vcmask 64512   ;;  %v3052_v35 = vld [vmem:[%s3291_s4] sm:$0xff]  }
  0xa1   : > { %s2076_s24 = sshll.u32 %s3361_s1, 3  ;;  %2118 = vmatprep.subr.bf16.mxu0 %v2726_v0  ;;  %v3059_v43 = vld [vmem:[#allocation10] sm:$0xff]   ;;  %v3063_v44 = vld [vmem:[#allocation8] ss:$0 sm:$0xff]  ;;  %v3071_v61 = vld [vmem:[%s3298_s11] sm:$0xff]   ;;  %s687_s29 = sand.u32 1, %s2705_s28  }
  0xa2   : > { %v3084_v1 = vld [vmem:[%s3297_s10] sm:$0xff]   ;;  %v3088_v3 = vld [vmem:[#allocation11] sm:$0x1]  ;;  %s2025_s23 = sshll.u32 %s687_s29, 1  ;;  %s3174_s5 = scalar_lea.vmem %s3305_s18, %s2076_s24  ;;  %vm1303_vm11 = vcmask 7168   ;;  %vm823_vm12 = vcmask 57344  }
  0xa3   : > { %s3179_s7 = scalar_lea.vmem [#allocation17], %s2025_s23  ;;  %p3350_p2 = scmp.ne.s32.totalorder %s3327_s2, 0 }
  0xa4   : > { %s3008_s27 = scalar_lea.vmem %s3348_s19, %s2076_s24  ;;  %s1824_s1 = sshll.u32 %s3179_s7, 4  ;;  %s3234_s1 = int_to_ptr.vmem [resolvable:$true] %s1824_s1 }
  0xa5   : > { %v2368_v5 = vld [vmem:[%s3008_s27] sm:$0xff]   ;;  %s2077_s24 = sshll.u32 %s2848_s0, 5  ;;  %s3349_s19 = sld [smem:[#allocation35_spill]] }
  0xa6   : > { %s2633_s0 = scalar_lea.vmem %s3234_s1, 32  ;;  %s2729_s20 = smov [#allocation17]  }
  0xa7   : > { %p2634_p1 = scmp.ne.s32.totalorder %s3234_s1, %s2633_s0  ;;  %s2637_s25 = sshll.u32 %s2729_s20, 4  ;;  %s2638_s25 = int_to_ptr.vmem [resolvable:$false] %s2637_s25 }
  0xa8   : > { %2119 = vmatpush3.bf16.xpose.msra.mxu0 %v3016_v4  ;;  %s2639_s23 = scalar_lea.vmem %s2638_s25, 64  ;;  %p2640_p13 = scmp.lt.s32.totalorder %s3234_s1, %s2638_s25 }
  0xa9   : > { %2142 = vmatprep.subr.bf16.mxu0 %v2726_v0  ;;  %p2635_p9 = pnand %p2634_p1, %p3350_p2  ;;  %p2641_p5 = scmp.lt.s32.totalorder %s2639_s23, %s2633_s0 }
  0xab   : > { %p2636_p3 = pneg %p2635_p9  ;;  %p2642_p6 = por %p2641_p5, %p2640_p13 }
  0xad   : > { %p2643_p10 = pnand %p2642_p6, %p2636_p3 }
  0xaf   : > { %2121 = vmatmul.mubr.msk.bf16.vlgmr.msra.gmra.mxu0 %vm750_vm1, %v2368_v5  ;;  %v3090_v5 = vld [vmem:[#allocation13] sm:$0x1] }
  0xb0   : > { %2144 = vmatprep.mubr.msk.bf16.mxu0 %vm2727_vm0, %v2726_v0  ;;  %2143 = vmatpush3.bf16.msra.mxu0 %v3059_v43 }
  0xb1   : > { %2154 = vmatprep.subr.bf16.mxu0 %v2726_v0 }
 0x16f   : > { %v794_v6 = vpop.f32.mrf.mxu0 }
 0x170   : > { %v2036_v7 = vmul.f32 -1.442695, %v794_v6  ;;  %v810_v10 = vsel %vm809_vm2, %v794_v6, -inf  ;;  %v807_v14 = vadd.f32 %v3024_v9, %v794_v6 }
 0x171   : > { %v2122_v8 = vpop.f32.mrf.mxu0 }
 0x172   : > { %2375 = vpow2.f32 %v2036_v7  ;;  %v3093_v8 = vld [vmem:[#allocation14] sm:$0x1] }
 0x173   : > { %v797_v11 = vpop.f32.mrf.mxu0 }
 0x174   : > { %v811_v12 = vsel %vm809_vm2, %v797_v11, -inf  ;;  %v2037_v13 = vmul.f32 -1.442695, %v797_v11  ;;  %v808_v15 = vadd.f32 %v3024_v9, %v797_v11 }
 0x175   : > { %v3030_v16 = vmax.f32 %v810_v10, %v811_v12  ;;  %v2123_v17 = vpop.f32.mrf.mxu0 }
 0x176   : > { %2377 = vpow2.f32 %v2037_v13  ;;  %v838_v18 = vpack.c.bf16 %v808_v15, %v807_v14 }
 0x178   : > { %2125 = vmatpush3.bf16.msra.mxu1 %v838_v18 }
 0x179   : > { %2130 = vmatprep.subr.bf16.mxu1 %v2726_v0 }
 0x17f   : > { %v2376_v19 = vpop.eup %2375 }
 0x180   : > { %v831_v20 = vadd.f32 1.0, %v2376_v19 }
 0x182   : > { %2379 = vrcp.f32 %v831_v20 }
 0x183   : > { %v2378_v21 = vpop.eup %2377 }
 0x184   : > { %v832_v22 = vadd.f32 1.0, %v2378_v21 }
 0x186   : > { %2381 = vrcp.f32 %v832_v22 }
 0x18f   : > { %v2380_v23 = vpop.eup %2379 }
 0x193   : > { %v2382_v24 = vpop.eup %2381 }
 0x194   : > { %v837_v25 = vpack.c.bf16 %v2382_v24, %v2380_v23  ;;  %v1130_v24 = vlaneseq }
 0x196   : > { %840 = vrot.lane.b32.xlu0 %v837_v25, %s2728_s17  ;;  %v3102_v25 = vshrl.u32 %v1130_v24, 7 }
 0x208   : > { %v841_v26 = vpop.permute.xlu0 %840 }
 0x209   : > { %843 = vxpose.xlu0.c.b16.start.end [1/1] (short) (narrow) %v841_v26, 16  ;;  %v3104_v26 = vld [vmem:[#allocation16] sm:$0x1] }
 0x26b   : > { %v851_v27 = vpop.trf.xlu0 }
 0x26c   : > { %2127 = vmatmul.mubr.msk.bf16.vlgmr.msra.gmra.mxu1 %vm859_vm3, %v851_v27  ;;  %v1132_v27 = vsub.s32 0, %v3102_v25 }
 0x26d   : > { %2132 = vmatprep.mubr.msk.bf16.mxu1 %vm2727_vm0, %v2726_v0 }
 0x32c   : > { %v3037_v28 = vpop.f32.mrf.mxu1 }
 0x32d   : > { %v903_v29 = vpack.c.bf16 %v3037_v28, %v3037_v28 }
 0x32e   : > { %v2128_v30 = vpop.f32.mrf.mxu1 }
 0x32f   : > { %v910_v31 = vsel %vm908_vm4, %v903_v29, 0 }
 0x330   : > { %v900_v32 = vpop.f32.mrf.mxu1  ;;  %2131 = vmatpush3.bf16.msra.mxu1 %v910_v31 }
 0x331   : > { %2136 = vmatprep.subr.bf16.mxu1 %v2726_v0 }
 0x332   : > { %v2129_v34 = vpop.f32.mrf.mxu1 }
 0x333   : > { %2133 = vmatmul.mubr.msk.bf16.vlgmr.msra.gmra.mxu1 %vm904_vm5, %v3042_v33 }
 0x334   : > { %2138 = vmatprep.mubr.msk.bf16.mxu1 %vm2727_vm0, %v2726_v0  ;;  %2137 = vmatpush3.bf16.msra.mxu1 %v3052_v35 }
 0x335   : > { %2148 = vmatprep.subr.bf16.mxu1 %v2726_v0 }
 0x3f3   : > { %v946_v36 = vpop.f32.mrf.mxu1 }
 0x3f4   : > { %vm952_vm6 = vcmp.gt.f32.partialorder %v946_v36, 0.0  ;;  %v953_v37 = vmul.f32 0.2, %v946_v36 }
 0x3f5   : > { %v2134_v38 = vpop.f32.mrf.mxu1 }
 0x3f6   : > { %v954_v39 = vsel %vm952_vm6, %v946_v36, %v953_v37 }
 0x3f7   : > { %v955_v40 = vpack.c.bf16 %v954_v39, %v954_v39  ;;  %v949_v41 = vpop.f32.mrf.mxu1 }
 0x3f9   : > { %v2135_v42 = vpop.f32.mrf.mxu1  ;;  %2139 = vmatmul.mubr.msk.bf16.vlgmr.msra.gmra.mxu1 %vm859_vm3, %v955_v40 }
 0x3fa   : > { %2150 = vmatprep.mubr.msk.bf16.mxu1 %vm2727_vm0, %v2726_v0  ;;  %2149 = vmatpush3.bf16.msra.mxu1 %v3084_v1 }
 0x3fb   : > { %2160 = vmatprep.subr.bf16.mxu1 %v2726_v0 }
 0x4b9   : > { %v1005_v45 = vpop.f32.mrf.mxu1 }
 0x4ba   : > { %v1006_v46 = vadd.f32 %v3063_v44, %v1005_v45  ;;  %v2373_v45 = vld [vmem:[%s3008_s27 + $0x8] sm:$0xff]   ;;  %s3241_s27 = scalar_lea.hbm %s3349_s19, %s2077_s24 }
 0x4bb   : > { %v2140_v47 = vpop.f32.mrf.mxu1 }
 0x4bc   : > { %vm1011_vm7 = vcmp.gt.f32.partialorder %v1006_v46, 0.0  ;;  %v1012_v48 = vmul.f32 0.2, %v1006_v46 }
 0x4bd   : > { %v1008_v49 = vpop.f32.mrf.mxu1 }
 0x4be   : > { %v1013_v50 = vsel %vm1011_vm7, %v1006_v46, %v1012_v48 }
 0x4bf   : > { %v1014_v51 = vadd.f32 %v1013_v50, %v3037_v28  ;;  %v2141_v52 = vpop.f32.mrf.mxu1 }
 0x4c1   : > { %v1016_v53 = vsel %vm859_vm3, %v1014_v51, 0.0  ;;  %v1015_v63 = vpack.c.bf16 %v1014_v51, %v1014_v51 }
 0x4c2   : > { %v1017_v54 = vrot.slane %v1016_v53, 4 }
 0x4c3   : > { %v1193_v22 = vsel %vm908_vm4, %v1015_v63, 0 }
 0x4c4   : > { %v1018_v55 = vadd.f32 %v1017_v54, %v1016_v53 }
 0x4c6   : > { %v1019_v56 = vrot.slane %v1018_v55, 2 }
 0x4c8   : > { %v1020_v57 = vadd.f32 %v1019_v56, %v1018_v55 }
 0x4ca   : > { %v1021_v58 = vrot.slane %v1020_v57, 1 }
 0x4cc   : > { %v1022_v59 = vadd.f32 %v1021_v58, %v1020_v57 }
 0x4ce   : > { %v1024_v60 = vmul.f32 0.125, %v1022_v59 }
 0x4d0   : > { %v1025_v62 = vpack.c.bf16 %v1024_v60, %v1024_v60 }
 0x4d2   : > { %2145 = vmatmul.mubr.msk.bf16.vlgmr.msra.gmra.mxu0 %vm859_vm3, %v1025_v62 }
 0x4d3   : > { %2155 = vmatpush3.bf16.msra.mxu0 %v3071_v61  ;;  %2156 = vmatprep.mubr.msk.bf16.mxu0 %vm2727_vm0, %v2726_v0 }
 0x4d4   : > { %2166 = vmatprep.subr.bf16.mxu0 %v2726_v0 }
 0x4da   : > { %2157 = vmatmul.mubr.msk.bf16.vlgmr.msra.gmra.mxu0 %vm859_vm3, %v1015_v63 }
 0x4db   : > { %2168 = vmatprep.mubr.msk.bf16.mxu0 %vm2727_vm0, %v2726_v0 }
 0x592   : > { %v1069_v6 = vpop.f32.mrf.mxu0 }
 0x593   : > { %v1070_v7 = vadd.f32 %v1069_v6, %v3088_v3 }
 0x594   : > { %v2146_v10 = vpop.f32.mrf.mxu0 }
 0x595   : > { %v1075_v11 = vmul.f32 %v1070_v7, %v3090_v5 }
 0x596   : > { %v1072_v12 = vpop.f32.mrf.mxu0 }
 0x597   : > { %v1076_v13 = vadd.f32 %v1075_v11, %v3093_v8 }
 0x598   : > { %v2147_v14 = vpop.f32.mrf.mxu0 }
 0x599   : > { %vm1077_vm8 = vcmp.gt.f32.partialorder %v1076_v13, 0.0  ;;  %v1078_v15 = vmul.f32 0.2, %v1076_v13 }
 0x59a   : > { %v1177_v17 = vpop.f32.mrf.mxu0 }
 0x59b   : > { %v1079_v18 = vsel %vm1077_vm8, %v1076_v13, %v1078_v15  ;;  %v3144_v15 = vld [vmem:[%s3301_s14] ss:$0 sm:$0xff] }
 0x59c   : > { %v1080_v19 = vpack.c.bf16 %v1079_v18, %v1079_v18  ;;  %v2158_v20 = vpop.f32.mrf.mxu0 }
 0x59e   : > { %2151 = vmatmul.mubr.msk.bf16.vlgmr.msra.gmra.mxu1 %vm859_vm3, %v1080_v19  ;;  %v1180_v21 = vpop.f32.mrf.mxu0 }
 0x59f   : > { %2161 = vmatpush3.bf16.msra.mxu1 %v1193_v22  ;;  %2162 = vmatprep.mubr.msk.bf16.mxu1 %vm2727_vm0, %v2726_v0 }
 0x5a0   : > { %v2159_v23 = vpop.f32.mrf.mxu0  ;;  %2172 = vmatprep.subr.bf16.mxu1 %v2726_v0 }
 0x5a1   : > { %v3150_v23 = vld [vmem:[%s3302_s15] sm:$0xff] }
 0x65e   : > { %v1124_v29 = vpop.f32.mrf.mxu1 }
 0x65f   : > { %v1125_v30 = vadd.f32 %v1124_v29, %v3104_v26 }
 0x660   : > { %v2152_v31 = vpop.f32.mrf.mxu1 }
 0x661   : > { %v1133_v32 = vrot.slane %v1125_v30, %v1132_v27 }
 0x662   : > { %v1127_v34 = vpop.f32.mrf.mxu1 }
 0x663   : > { %v1178_v36 = vadd.f32 %v1177_v17, %v1133_v32  ;;  %v813_v32 = vrot.slane %v3030_v16, 4 }
 0x664   : > { %v2153_v37 = vpop.f32.mrf.mxu1 }
 0x665   : > { %v2049_v38 = vmul.f32 -1.442695, %v1178_v36  ;;  %v814_v34 = vmax.f32 %v3030_v16, %v813_v32 }
 0x667   : > { %2383 = vpow2.f32 %v2049_v38  ;;  %v815_v36 = vrot.slane %v814_v34, 2 }
 0x669   : > { %v816_v37 = vmax.f32 %v814_v34, %v815_v36 }
 0x66b   : > { %v817_v38 = vrot.slane %v816_v37, 1 }
 0x674   : > { %v2384_v39 = vpop.eup %2383 }
 0x675   : > { %v1186_v40 = vadd.f32 1.0, %v2384_v39  ;;  %v818_v39 = vmax.f32 %v816_v37, %v817_v38 }
 0x677   : > { %2385 = vrcp.f32 %v1186_v40 }
 0x684   : > { %v2386_v41 = vpop.eup %2385 }
 0x685   : > { %v1189_v42 = vpack.c.bf16 %v2386_v41, %v2386_v41 }
 0x687   : > { %2163 = vmatmul.mubr.msk.bf16.vlgmr.msra.gmra.mxu1 %vm904_vm5, %v1189_v42 }
 0x688   : > { %2173 = vmatpush3.bf16.xpose.msra.mxu1 %v3011_v2  ;;  %2176 = vmatprep.mubr.msk.bf16.mxu1 %vm2727_vm0, %v2726_v0  ;;  %v3126_v2 = vld [vmem:[%s3300_s13] sm:$0xff]  }
 0x689   : > { %2174 = vmatprep.subr.bf16.mxu1 %v2726_v0  ;;  %2167 = vmatpush3.bf16.msra.mxu0 %v3126_v2 }
 0x68a   : > { %2180 = vmatprep.subr.bf16.mxu0 %v2726_v0 }
 0x690   : > { %2175 = vmatpush3.bf16.xpose.msra.mxu1 %v3016_v4 }
 0x691   : > { %2192 = vmatprep.subr.bf16.mxu1 %v2726_v0 }
 0x697   : > { %2177 = vmatmul.mubr.msk.bf16.vlgmr.msra.gmra.mxu1 %vm750_vm1, %v2373_v45 }
 0x698   : > { %2193 = vmatpush3.bf16.msra.mxu1 %v3052_v35  ;;  %2194 = vmatprep.mubr.msk.bf16.mxu1 %vm2727_vm0, %v2726_v0 }
 0x699   : > { %2204 = vmatprep.subr.bf16.mxu1 %v2726_v0 }
 0x747   : > { %v1229_v4 = vpop.f32.mrf.mxu1 }
 0x748   : > { %vm1235_vm9 = vcmp.gt.f32.partialorder %v1229_v4, 0.0  ;;  %v1236_v46 = vmul.f32 0.2, %v1229_v4 }
 0x749   : > { %v2164_v47 = vpop.f32.mrf.mxu1 }
 0x74a   : > { %v1237_v48 = vsel %vm1235_vm9, %v1229_v4, %v1236_v46 }
 0x74b   : > { %v1238_v35 = vpack.c.bf16 %v1237_v48, %v1237_v48  ;;  %v1232_v49 = vpop.f32.mrf.mxu1 }
 0x74d   : > { %v2165_v50 = vpop.f32.mrf.mxu1  ;;  %2169 = vmatmul.mubr.msk.bf16.vlgmr.msra.gmra.mxu0 %vm859_vm3, %v1238_v35 }
 0x74e   : > { %2182 = vmatprep.mubr.msk.bf16.mxu0 %vm2727_vm0, %v2726_v0 }
 0x757   : > { %v1350_v51 = vpop.f32.mrf.mxu1 }
 0x758   : > { %v2059_v52 = vmul.f32 -1.442695, %v1350_v51  ;;  %v1357_v54 = vadd.f32 %v3024_v9, %v1350_v51  ;;  %v1359_v56 = vsel %vm809_vm2, %v1350_v51, -inf }
 0x759   : > { %v2178_v53 = vpop.f32.mrf.mxu1 }
 0x75a   : > { %2387 = vpow2.f32 %v2059_v52 }
 0x75b   : > { %v1353_v55 = vpop.f32.mrf.mxu1 }
 0x75c   : > { %v1358_v57 = vadd.f32 %v3024_v9, %v1353_v55  ;;  %v1360_v58 = vsel %vm809_vm2, %v1353_v55, -inf  ;;  %v2060_v59 = vmul.f32 -1.442695, %v1353_v55 }
 0x75d   : > { %v3137_v60 = vmax.f32 %v1359_v56, %v1360_v58  ;;  %v2179_v62 = vpop.f32.mrf.mxu1 }
 0x75e   : > { %2389 = vpow2.f32 %v2060_v59  ;;  %v1387_v63 = vpack.c.bf16 %v1358_v57, %v1357_v54 }
 0x760   : > { %2181 = vmatpush3.bf16.msra.mxu0 %v1387_v63 }
 0x761   : > { %2186 = vmatprep.subr.bf16.mxu0 %v2726_v0 }
 0x767   : > { %v2388_v6 = vpop.eup %2387 }
 0x768   : > { %v1380_v7 = vadd.f32 1.0, %v2388_v6 }
 0x76a   : > { %2391 = vrcp.f32 %v1380_v7 }
 0x76b   : > { %v2390_v10 = vpop.eup %2389 }
 0x76c   : > { %v1381_v11 = vadd.f32 1.0, %v2390_v10 }
 0x76e   : > { %2393 = vrcp.f32 %v1381_v11 }
 0x777   : > { %v2392_v12 = vpop.eup %2391 }
 0x77b   : > { %v2394_v13 = vpop.eup %2393 }
 0x77c   : > { %v1386_v9 = vpack.c.bf16 %v2394_v13, %v2392_v12 }
 0x77e   : > { %1389 = vrot.lane.b32.xlu1 %v1386_v9, %s2728_s17 }
 0x7f0   : > { %v1390_v14 = vpop.permute.xlu1 %1389 }
 0x7f1   : > { %1392 = vxpose.xlu1.c.b16.start.end [1/1] (short) (narrow) %v1390_v14, 16 }
 0x80d   : > { %v1288_v17 = vpop.f32.mrf.mxu0 }
 0x80e   : > { %v1289_v18 = vadd.f32 %v3144_v15, %v1288_v17 }
 0x80f   : > { %v2170_v19 = vpop.f32.mrf.mxu0 }
 0x810   : > { %vm1294_vm10 = vcmp.gt.f32.partialorder %v1289_v18, 0.0  ;;  %v1295_v20 = vmul.f32 0.2, %v1289_v18 }
 0x811   : > { %v1291_v21 = vpop.f32.mrf.mxu0 }
 0x812   : > { %v1296_v22 = vsel %vm1294_vm10, %v1289_v18, %v1295_v20 }
 0x813   : > { %v2171_v24 = vpop.f32.mrf.mxu0  ;;  %v1297_v29 = vadd.f32 %v1296_v22, %v3037_v28  ;;  %v3165_v28 = vld [vmem:[%s3303_s16] sm:$0xff] }
 0x815   : > { %v1298_v30 = vmul.f32 %v1297_v29, %v3150_v23 }
 0x817   : > { %v1299_v31 = vsel %vm859_vm3, %v1298_v30, 0.0 }
 0x818   : > { %1300 = vadd.xlane.f32.xlu0 %v1299_v31 }
 0x82e   : > { %820 = vrot.lane.b32.xlu0 %v818_v39, %s2728_s17 }
 0x853   : > { %v1400_v40 = vpop.trf.xlu1 }
 0x854   : > { %2183 = vmatmul.mubr.msk.bf16.vlgmr.msra.gmra.mxu0 %vm859_vm3, %v1400_v40 }
 0x855   : > { %2188 = vmatprep.mubr.msk.bf16.mxu0 %vm2727_vm0, %v2726_v0 }
 0x8a1   : > { %v1301_v16 = vpop.xlane.xlu0 %1300 }
 0x8a2   : > { %v1302_v41 = vadd.f32 %v1301_v16, %v3165_v28 }
 0x8a4   : > { %1304 = vst.msk [vmem:[%s3174_s5] sm:$0xff] %vm1303_vm11, %v1302_v41 }
 0x8a5   : > { %v821_v42 = vpop.permute.xlu0 %820 }
 0x8a6   : > { %824 = vst.msk [vmem:[%s3179_s7] sm:$0x1] %vm823_vm12, %v821_v42 }
 0x914   : > { %v3183_v45 = vpop.f32.mrf.mxu0 }
 0x915   : > { %v1451_v4 = vpack.c.bf16 %v3183_v45, %v3183_v45 }
 0x916   : > { %v2184_v46 = vpop.f32.mrf.mxu0 }
 0x917   : > { %v1453_v47 = vsel %vm908_vm4, %v1451_v4, 0 }
 0x918   : > { %v1448_v48 = vpop.f32.mrf.mxu0  ;;  %2187 = vmatpush3.bf16.msra.mxu0 %v1453_v47 }
 0x919   : > { %2198 = vmatprep.subr.bf16.mxu0 %v2726_v0 }
 0x91a   : > { %v2185_v35 = vpop.f32.mrf.mxu0 }
 0x91b   : > { %2189 = vmatmul.mubr.msk.bf16.vlgmr.msra.gmra.mxu0 %vm904_vm5, %v3042_v33 }
 0x91c   : > { %2199 = vmatpush3.bf16.msra.mxu0 %v3059_v43  ;;  %2200 = vmatprep.mubr.msk.bf16.mxu0 %vm2727_vm0, %v2726_v0 }
 0x91d   : > { %2210 = vmatprep.subr.bf16.mxu0 %v2726_v0 }
 0x9db   : > { %v1489_v49 = vpop.f32.mrf.mxu0 }
 0x9dc   : > { %vm1495_vm13 = vcmp.gt.f32.partialorder %v1489_v49, 0.0  ;;  %v1496_v50 = vmul.f32 0.2, %v1489_v49 }
 0x9dd   : > { %v2190_v51 = vpop.f32.mrf.mxu0 }
 0x9de   : > { %v1497_v52 = vsel %vm1495_vm13, %v1489_v49, %v1496_v50 }
 0x9df   : > { %v1498_v53 = vpack.c.bf16 %v1497_v52, %v1497_v52  ;;  %v1492_v54 = vpop.f32.mrf.mxu0 }
 0x9e1   : > { %v2191_v55 = vpop.f32.mrf.mxu0  ;;  %2195 = vmatmul.mubr.msk.bf16.vlgmr.msra.gmra.mxu1 %vm859_vm3, %v1498_v53 }
 0x9e2   : > { %2205 = vmatpush3.bf16.msra.mxu1 %v3084_v1  ;;  %2206 = vmatprep.mubr.msk.bf16.mxu1 %vm2727_vm0, %v2726_v0  ;;  %v1362_v55 = vrot.slane %v3137_v60, 4 }
 0x9e3   : > { %2216 = vmatprep.subr.bf16.mxu1 %v2726_v0 }
 0xaa1   : > { %v1536_v33 = vpop.f32.mrf.mxu1 }
 0xaa2   : > { %v1537_v43 = vadd.f32 %v3063_v44, %v1536_v33 }
 0xaa3   : > { %v2196_v56 = vpop.f32.mrf.mxu1 }
 0xaa4   : > { %vm1542_vm14 = vcmp.gt.f32.partialorder %v1537_v43, 0.0  ;;  %v1543_v57 = vmul.f32 0.2, %v1537_v43 }
 0xaa5   : > { %v1539_v58 = vpop.f32.mrf.mxu1 }
 0xaa6   : > { %v1544_v59 = vsel %vm1542_vm14, %v1537_v43, %v1543_v57  ;;  %v1363_v57 = vmax.f32 %v3137_v60, %v1362_v55 }
 0xaa7   : > { %v1545_v62 = vadd.f32 %v1544_v59, %v3183_v45  ;;  %v2197_v63 = vpop.f32.mrf.mxu1 }
 0xaa8   : > { %v1364_v58 = vrot.slane %v1363_v57, 2 }
 0xaa9   : > { %v1547_v6 = vsel %vm859_vm3, %v1545_v62, 0.0  ;;  %v1546_v44 = vpack.c.bf16 %v1545_v62, %v1545_v62 }
 0xaaa   : > { %v1548_v7 = vrot.slane %v1547_v6, 4  ;;  %v1365_v59 = vmax.f32 %v1363_v57, %v1364_v58 }
 0xaab   : > { %v1705_v34 = vsel %vm908_vm4, %v1546_v44, 0 }
 0xaac   : > { %v1549_v1 = vadd.f32 %v1548_v7, %v1547_v6  ;;  %v1366_v62 = vrot.slane %v1365_v59, 1 }
 0xaae   : > { %v1550_v10 = vrot.slane %v1549_v1, 2  ;;  %v1367_v63 = vmax.f32 %v1365_v59, %v1366_v62 }
 0xab0   : > { %v1551_v11 = vadd.f32 %v1550_v10, %v1549_v1 }
 0xab2   : > { %v1552_v12 = vrot.slane %v1551_v11, 1 }
 0xab4   : > { %v1553_v13 = vadd.f32 %v1552_v12, %v1551_v11 }
 0xab6   : > { %v1554_v9 = vmul.f32 0.125, %v1553_v13 }
 0xab8   : > { %v1555_v14 = vpack.c.bf16 %v1554_v9, %v1554_v9 }
 0xaba   : > { %2201 = vmatmul.mubr.msk.bf16.vlgmr.msra.gmra.mxu0 %vm859_vm3, %v1555_v14 }
 0xabb   : > { %2211 = vmatpush3.bf16.msra.mxu0 %v3071_v61  ;;  %2212 = vmatprep.mubr.msk.bf16.mxu0 %vm2727_vm0, %v2726_v0 }
 0xabc   : > { %2222 = vmatprep.subr.bf16.mxu0 %v2726_v0 }
 0xac2   : > { %2213 = vmatmul.mubr.msk.bf16.vlgmr.msra.gmra.mxu0 %vm859_vm3, %v1546_v44 }
 0xac3   : > { %2223 = vmatpush3.bf16.msra.mxu0 %v3126_v2  ;;  %2224 = vmatprep.mubr.msk.bf16.mxu0 %vm2727_vm0, %v2726_v0 }
 0xb7a   : > { %v1593_v17 = vpop.f32.mrf.mxu0 }
 0xb7b   : > { %v1594_v18 = vadd.f32 %v1593_v17, %v3088_v3 }
 0xb7c   : > { %v2202_v19 = vpop.f32.mrf.mxu0 }
 0xb7d   : > { %v1599_v20 = vmul.f32 %v1594_v18, %v3090_v5 }
 0xb7e   : > { %v1596_v61 = vpop.f32.mrf.mxu0 }
 0xb7f   : > { %v1600_v21 = vadd.f32 %v1599_v20, %v3093_v8 }
 0xb80   : > { %v2203_v22 = vpop.f32.mrf.mxu0 }
 0xb81   : > { %vm1601_vm15 = vcmp.gt.f32.partialorder %v1600_v21, 0.0  ;;  %v1602_v24 = vmul.f32 0.2, %v1600_v21 }
 0xb82   : > { %v1689_v29 = vpop.f32.mrf.mxu0 }
 0xb83   : > { %v1603_v30 = vsel %vm1601_vm15, %v1600_v21, %v1602_v24 }
 0xb84   : > { %v1604_v31 = vpack.c.bf16 %v1603_v30, %v1603_v30  ;;  %v2214_v32 = vpop.f32.mrf.mxu0 }
 0xb86   : > { %2207 = vmatmul.mubr.msk.bf16.vlgmr.msra.gmra.mxu1 %vm859_vm3, %v1604_v31  ;;  %v1692_v2 = vpop.f32.mrf.mxu0 }
 0xb87   : > { %2217 = vmatpush3.bf16.msra.mxu1 %v1705_v34  ;;  %2218 = vmatprep.mubr.msk.bf16.mxu1 %vm2727_vm0, %v2726_v0 }
 0xb88   : > { %v2215_v3 = vpop.f32.mrf.mxu0 }
 0xc46   : > { %v1642_v5 = vpop.f32.mrf.mxu1 }
 0xc47   : > { %v1643_v8 = vadd.f32 %v1642_v5, %v3104_v26 }
 0xc48   : > { %v2208_v36 = vpop.f32.mrf.mxu1 }
 0xc49   : > { %v1651_v37 = vrot.slane %v1643_v8, %v1132_v27 }
 0xc4a   : > { %v1645_v38 = vpop.f32.mrf.mxu1 }
 0xc4b   : > { %v1690_v39 = vadd.f32 %v1689_v29, %v1651_v37 }
 0xc4c   : > { %v2209_v40 = vpop.f32.mrf.mxu1 }
 0xc4d   : > { %v2067_v16 = vmul.f32 -1.442695, %v1690_v39 }
 0xc4f   : > { %2395 = vpow2.f32 %v2067_v16 }
 0xc5c   : > { %v2396_v41 = vpop.eup %2395 }
 0xc5d   : > { %v1698_v42 = vadd.f32 1.0, %v2396_v41 }
 0xc5f   : > { %2397 = vrcp.f32 %v1698_v42 }
 0xc6c   : > { %v2398_v4 = vpop.eup %2397 }
 0xc6d   : > { %v1701_v46 = vpack.c.bf16 %v2398_v4, %v2398_v4 }
 0xc6f   : > { %2219 = vmatmul.mubr.msk.bf16.vlgmr.msra.gmra.mxu1 %vm904_vm5, %v1701_v46 }
 0xd2f   : > { %v1741_v0 = vpop.f32.mrf.mxu1 }
 0xd30   : > { %vm1747_vm0 = vcmp.gt.f32.partialorder %v1741_v0, 0.0  ;;  %v1748_v47 = vmul.f32 0.2, %v1741_v0 }
 0xd31   : > { %v2220_v26 = vpop.f32.mrf.mxu1 }
 0xd32   : > { %v1749_v48 = vsel %vm1747_vm0, %v1741_v0, %v1748_v47 }
 0xd33   : > { %v1750_v35 = vpack.c.bf16 %v1749_v48, %v1749_v48  ;;  %v1744_v25 = vpop.f32.mrf.mxu1 }
 0xd35   : > { %v2221_v27 = vpop.f32.mrf.mxu1  ;;  %2225 = vmatmul.mubr.msk.bf16.vlgmr.msra.gmra.mxu0 %vm859_vm3, %v1750_v35 }
 0xdf5   : > { %v1788_v49 = vpop.f32.mrf.mxu0 }
 0xdf6   : > { %v1789_v50 = vadd.f32 %v3144_v15, %v1788_v49 }
 0xdf7   : > { %v2226_v51 = vpop.f32.mrf.mxu0 }
 0xdf8   : > { %vm1794_vm1 = vcmp.gt.f32.partialorder %v1789_v50, 0.0  ;;  %v1795_v52 = vmul.f32 0.2, %v1789_v50 }
 0xdf9   : > { %v1791_v53 = vpop.f32.mrf.mxu0 }
 0xdfa   : > { %v1796_v54 = vsel %vm1794_vm1, %v1789_v50, %v1795_v52 }
 0xdfb   : > { %v2227_v33 = vpop.f32.mrf.mxu0  ;;  %v1797_v43 = vadd.f32 %v1796_v54, %v3183_v45 }
 0xdfd   : > { %v1798_v56 = vmul.f32 %v1797_v43, %v3150_v23 }
 0xdff   : > { %v1799_v15 = vsel %vm859_vm3, %v1798_v56, 0.0 }
 0xe00   : > { %1800 = vadd.xlane.f32.xlu1 %v1799_v15 }
 0xe11   : > { %1369 = vrot.lane.b32.xlu1 %v1367_v63, %s2728_s17  ;;  %s3247_s17 = scalar_lea.sflag [#allocation4], %s687_s29 }
 0xe89   : > { %v1801_v6 = vpop.xlane.xlu1 %1800 }
 0xe8a   : > { %v1802_v45 = vadd.f32 %v1801_v6, %v3165_v28 }
 0xe8c   : > { %2070 = vst.msk [vmem:[%s3174_s5 + $0x8] sm:$0xff] %vm1303_vm11, %v1802_v45 }
 0xe8d   : > { %v1370_v60 = vpop.permute.xlu1 %1369 }
 0xe8e   : > { %2058 = vst.msk [vmem:[%s3179_s7 + $0x1] sm:$0x1] %vm823_vm12, %v1370_v60 }
 0xe8f   : > { %2646 = shalt.err (!%p2643_p10)
}
 0xe90   : > { %s2647_s29 = scalar_lea.hbm %s3241_s27, 32  ;;  %s2651_s5 = scalar_lea.hbm %s3349_s19, 64 }
 0xe91   : > { %p2648_p12 = scmp.ne.s32.totalorder %s3241_s27, %s2647_s29  ;;  %p2652_p8 = scmp.lt.s32.totalorder %s3241_s27, %s3349_s19 }
 0xe92   : > { %p2653_p11 = scmp.lt.s32.totalorder %s2651_s5, %s2647_s29 }
 0xe93   : > { %p2649_p4 = pnand %p2648_p12, %p3350_p2 }
 0xe94   : > { %p2654_p0 = por %p2653_p11, %p2652_p8 }
 0xe95   : > { %p2650_p7 = pneg %p2649_p4 }
 0xe97   : > { %p2655_p1 = pnand %p2654_p0, %p2650_p7 }
 0xe99   : > { %2658 = shalt.err (!%p2655_p1)
}
 0xe9a   : > { %s2730_s21 = smov 16   ;;  %s2731_s22 = smov 1  }
 0xe9b   : > { %2264 = dma.vmem_to_hbm [thread:$0]  (%p3350_p2), %s3234_s1, 32, %s3241_s27, %s3247_s17, %s2730_s21, %s2730_s21, %s2731_s22  }
 0xe9c PF: > { %s3351_s0 = sld [smem:[#allocation26_spill]] }
 0xe9d   : > { %s3352_s20 = sld [smem:[#allocation24_spill]] }
 0xe9e   : > { %s3353_s25 = sld [smem:[#allocation29_spill]] }
 0xea2   : > { %p2316_p9 = scmp.ge.s32.totalorder %s3351_s0, 2 }
 0xea3   : > { %s1843_s23 = sand.u32 1, %s3352_s20  }
 0xea4   : > { %p3354_p3 = scmp.ne.s32.totalorder %s3353_s25, 0  ;;  %s1844_s29 = scalar_lea.sflag [#allocation4], %s1843_s23 }
 0xea6   : > { %p2295_p13 = pnand %p2316_p9, %p3354_p3 }
 0xea8   : > { %p2296_p5 = pneg %p2295_p13 }
 0xeaa   : > { %2696 = dma.done.wait (%p2296_p5), %s1844_s29, 32  }
 0xeab   : > { %2698 = vsyncadd (%p2296_p5), %s1844_s29, 4294967264  ;;  %s3355_s30 = sld [smem:[#allocation27_spill]]  ;;  %s3358_s27 = smov %s2705_s28 }
 0xeac   : > { %s3356_s26 = sld [smem:[#allocation25_spill]] }
 0xead   : > { %s3357_s29 = sld [smem:[#allocation28_spill]] }
 0xeb1   : > { %p34_p6 = scmp.ge.s32.totalorder %s3355_s30, 4  }
 0xeb2   : > { %s3359_s28 = smov %s3356_s26 }
 0xeb3   :  { %36 = sbr.rel (!%p34_p6) target bundleno = 15 (0xf), region = 175 }
 0xeb8   :  { %1857 = vsyncpa [#allocation3], 1 }
 0xeb9   :  { %1859 = vsyncpa [#allocation3 + $0x1], 1 }
 0xeba   :  { %1860 = vsyncpa [#allocation6], 1 }
 0xebb   :  { %1861 = vsyncpa [#allocation9], 1 }
 0xebc   :  { %1862 = vsyncpa [#allocation12], 1 }
 0xebd   :  { %1863 = vsyncpa [#allocation15], 1 }
 0xebe   :  { %1864 = vsyncpa [#allocation4], 1 }
 0xebf   :  { %1866 = vsyncpa [#allocation4 + $0x1], 1 }

</bundles_post_ra>
